<compile_context>
chip_gen: v7x
topology: tpu7x:2x2x1
jax: 0.10.0
libtpu: 0.0.40
codegen_flags: <defaults>
</compile_context>

<pallas_src>
import jax
import jax.numpy as jnp
from jax.experimental import pallas as pl
from jax.experimental.pallas import tpu as pltpu

IN_FEATURES = 4096
OUT_FEATURES = 2
W_COLS = 128     # weight padded to lane-dense 128 columns (MXU-friendly)
OUT_COLS = 8     # only the first 8 accumulator columns are stored to HBM


def _round_up(n, m):
    return ((n + m - 1) // m) * m


def _device_config():
    """Returns (default_tile_rows, vmem_limit_bytes_or_None,
                tensorcores_per_chip, prefer_bf16_mxu)."""
    kind = ""
    try:
        kind = jax.devices()[0].device_kind.lower()
    except Exception:
        pass
    if "v7" in kind:
        # v7x: 64 MiB VMEM/TC, ~3.2 TB/s HBM, 2 TensorCores/chip.
        # TB=1024: 16 MiB x-tile x2 buffers + 4 MiB weight + ~1 MiB out ~ 37 MiB.
        return 1024, 48 * 1024 * 1024, 2, False
    if "v6" in kind:
        # v6e: 128 MiB VMEM, ~1.4 TB/s HBM -> big tiles, plenty of headroom.
        return 1024, 64 * 1024 * 1024, 1, False
    if "v5 lite" in kind or "v5lite" in kind or "v5e" in kind:
        # v5e: 16 MiB *default* scoped VMEM -> small tile + explicit limit.
        # f32 MXU ~ at parity with the x DMA -> demote MXU inputs to bf16.
        return 256, 32 * 1024 * 1024, 1, True
    # Unknown / older generations: conservative tile that fits the 16 MiB
    # default scoped-VMEM limit; leave the limit untouched.
    return 256, None, 1, False


def _make_linear_kernel(compute_dtype):
    def kernel(x_ref, w_ref, b_ref, o_ref):
        # x_ref: (TB, 4096), w_ref: (4096, 128), b_ref: (1, 8), o_ref: (TB, 8)
        acc = jnp.dot(x_ref[...].astype(compute_dtype),
                      w_ref[...].astype(compute_dtype),
                      preferred_element_type=jnp.float32)          # (TB, 128)
        # Narrow store: only the 8 useful columns go back to HBM; the masked
        # stores are tiny and fully hidden under the x-stream DMA.
        o_ref[...] = (acc[:, :OUT_COLS] + b_ref[...]).astype(o_ref.dtype)
    return kernel


def prepare_params(weight, bias):
    """Hoisted out of the per-call path: transpose + pad once per model.

    weight: (2, 4096) in PyTorch nn.Linear layout; bias: (2,).
    Returns (w_pad (4096, 128) f32, b_pad (1, 8) f32).
    """
    w_pad = jnp.pad(weight.T.astype(jnp.float32),
                    ((0, 0), (0, W_COLS - OUT_FEATURES)))
    b_pad = jnp.pad(bias.astype(jnp.float32).reshape(1, OUT_FEATURES),
                    ((0, 0), (0, OUT_COLS - OUT_FEATURES)))
    return w_pad, b_pad


def logistic_regression_forward(x, w_pad, b_pad, *, tile_rows=None,
                                compute_dtype=None):
    """x: (..., 4096). Returns x @ W.T + b with shape (..., 2)."""
    lead_shape = x.shape[:-1]
    x2 = x.reshape(-1, IN_FEATURES)
    B = x2.shape[0]

    tb_default, vmem_limit, num_cores, prefer_bf16 = _device_config()
    if tile_rows is None:
        tile_rows = tb_default
    if compute_dtype is None:
        # Accept bf16 x directly (do NOT cast in the wrapper: that would add a
        # full extra read+write of x).  bf16 MXU inputs also by default on v5e.
        compute_dtype = (jnp.bfloat16
                         if (prefer_bf16 or x2.dtype == jnp.bfloat16)
                         else jnp.float32)

    # Minimum sublane alignment for the x row tile given its dtype.
    align = {4: 8, 2: 16, 1: 32}.get(jnp.dtype(x2.dtype).itemsize, 8)

    if B < align:
        # Tiny batch: pad up to a single aligned tile (copies only a few KiB).
        x_in = jnp.pad(x2, ((0, align - B), (0, 0)))
        tb_eff = align
    else:
        # No whole-array pad of x: Pallas clips the ragged last block, and the
        # garbage rows only feed output rows that are never written back.
        x_in = x2
        n_tiles = max(pl.cdiv(B, tile_rows), num_cores)  # >= 2 tiles on v7x
        tb_eff = max(align, _round_up(pl.cdiv(B, n_tiles), align))
        tb_eff = min(tb_eff, (B // align) * align)  # block rows never exceed B

    rows = x_in.shape[0]
    grid = (pl.cdiv(rows, tb_eff),)

    x_itemsize = jnp.dtype(x_in.dtype).itemsize
    cost = pl.CostEstimate(
        flops=2 * rows * IN_FEATURES * W_COLS,
        transcendentals=0,
        bytes_accessed=(rows * IN_FEATURES * x_itemsize   # x stream (dominant)
                        + IN_FEATURES * W_COLS * 4        # resident weight
                        + rows * OUT_COLS * 4),           # narrow output
    )

    out = pl.pallas_call(
        _make_linear_kernel(compute_dtype),
        out_shape=jax.ShapeDtypeStruct((rows, OUT_COLS), x2.dtype),
        grid_spec=pltpu.PrefetchScalarGridSpec(
            num_scalar_prefetch=0,
            grid=grid,
            in_specs=[
                # x: streamed per batch tile; keep the default Buffered(2)
                # (deeper buffering would only burn VMEM, no overlap gain).
                pl.BlockSpec((tb_eff, IN_FEATURES), lambda i: (i, 0)),
                # weight / bias: constant block index -> DMA'd once, resident.
                # (Double-buffer cost of the weight, 4 MiB worst case, is
                #  already accounted for in the per-generation VMEM budget.)
                pl.BlockSpec((IN_FEATURES, W_COLS), lambda i: (0, 0)),
                pl.BlockSpec((1, OUT_COLS), lambda i: (0, 0)),
            ],
            out_specs=pl.BlockSpec((tb_eff, OUT_COLS), lambda i: (i, 0)),
        ),
        compiler_params=pltpu.CompilerParams(
            # Independent batch tiles: shard across TensorCores (v7x megacore).
            dimension_semantics=("parallel",),
            vmem_limit_bytes=vmem_limit,
        ),
        cost_estimate=cost,
    )(x_in, w_pad, b_pad)

    # Drop batch padding (tiny-batch path only) and the 6 padded lanes.
    return out[:B, :OUT_FEATURES].reshape(lead_shape + (OUT_FEATURES,))


if __name__ == "__main__":
    key = jax.random.PRNGKey(0)
    kx, kw, kb = jax.random.split(key, 3)

    B = 2
    x = jax.random.normal(kx, (B, IN_FEATURES), dtype=jnp.float32)

    # Deterministic parameter init mimicking nn.Linear default:
    # uniform(-1/sqrt(in_features), 1/sqrt(in_features))
    bound = 1.0 / (IN_FEATURES ** 0.5)
    weight = jax.random.uniform(
        kw, (OUT_FEATURES, IN_FEATURES), dtype=jnp.float32,
        minval=-bound, maxval=bound)
    bias = jax.random.uniform(
        kb, (OUT_FEATURES,), dtype=jnp.float32, minval=-bound, maxval=bound)

    # Padded params are prepared once per model, not per forward call.
    w_pad, b_pad = prepare_params(weight, bias)

    out = logistic_regression_forward(x, w_pad, b_pad)
    out = jax.block_until_ready(out)

    # Correctness check against plain JAX reference.  Tolerance also covers
    # the bf16-MXU path that is enabled by default on v5e (~1e-3 abs error).
    ref = x @ weight.T + bias
    assert out.shape == (B, OUT_FEATURES)
    assert jnp.allclose(out, ref, atol=2e-2, rtol=2e-2), (out, ref)

    print("KERNEL_OK")
</pallas_src>

<mosaic_0001>
module attributes {stable_mosaic.version = 11 : i64} {
  func.func @kernel(%arg0: i32, %arg1: memref<8x4096xf32, #tpu.memory_space<vmem>>, %arg2: memref<4096x128xf32, #tpu.memory_space<vmem>>, %arg3: memref<1x8xf32, #tpu.memory_space<vmem>>, %arg4: memref<8x8xf32, #tpu.memory_space<vmem>>) attributes {dimension_semantics = [#tpu.dimension_semantics<parallel>], iteration_bounds = array<i64: 1>, scalar_prefetch = 0 : i64, scratch_operands = 0 : i64, tpu.core_type = #tpu.core_type<tc>, window_params = [{transform_indices = @transform_0, window_bounds = array<i64: 8, 4096>}, {pipeline_mode = #tpu.pipeline_mode<synchronous>, transform_indices = @transform_1, window_bounds = array<i64: 4096, 128>}, {pipeline_mode = #tpu.pipeline_mode<synchronous>, transform_indices = @transform_2, window_bounds = array<i64: 1, 8>}, {transform_indices = @transform_3, window_bounds = array<i64: 8, 8>}]} {
    %c0 = arith.constant 0 : index
    %c0_0 = arith.constant 0 : index
    %0 = vector.load %arg1[%c0, %c0_0] : memref<8x4096xf32, #tpu.memory_space<vmem>>, vector<8x4096xf32>
    %c0_1 = arith.constant 0 : index
    %c0_2 = arith.constant 0 : index
    %1 = vector.load %arg2[%c0_1, %c0_2] : memref<4096x128xf32, #tpu.memory_space<vmem>>, vector<4096x128xf32>
    %cst = arith.constant dense<0.000000e+00> : vector<8x128xf32>
    %2 = tpu.matmul %0, %1, %cst {dimension_numbers = #tpu.dot_dimension_numbers<[1], [0], [0], [1], [0, 0, 1, 1], [], []>} : vector<8x4096xf32>, vector<4096x128xf32>, vector<8x128xf32> -> vector<8x128xf32>
    %3 = vector.extract_strided_slice %2 {offsets = [0, 0], sizes = [8, 8], strides = [1, 1]} : vector<8x128xf32> to vector<8x8xf32>
    %c0_3 = arith.constant 0 : index
    %c0_4 = arith.constant 0 : index
    %4 = vector.load %arg3[%c0_3, %c0_4] : memref<1x8xf32, #tpu.memory_space<vmem>>, vector<1x8xf32>
    %5 = vector.broadcast %4 : vector<1x8xf32> to vector<8x8xf32>
    %6 = arith.addf %3, %5 : vector<8x8xf32>
    %c0_5 = arith.constant 0 : index
    %c0_6 = arith.constant 0 : index
    %7 = vector.load %arg4[%c0_5, %c0_6] : memref<8x8xf32, #tpu.memory_space<vmem>>, vector<8x8xf32>
    tpu.vector_store %arg4[%c0_5, %c0_6], %6 {strides = array<i32>} : memref<8x8xf32, #tpu.memory_space<vmem>>, vector<8x8xf32>,
    return
  }
  func.func @transform_0(%arg0: i32) -> (i32, i32) {
    %c0_i32 = arith.constant 0 : i32
    %c0_i32_0 = arith.constant 0 : i32
    return %arg0, %c0_i32 : i32, i32
  }
  func.func @transform_1(%arg0: i32) -> (i32, i32) {
    %c0_i32 = arith.constant 0 : i32
    %c0_i32_0 = arith.constant 0 : i32
    %c0_i32_1 = arith.constant 0 : i32
    return %c0_i32, %c0_i32_0 : i32, i32
  }
  func.func @transform_2(%arg0: i32) -> (i32, i32) {
    %c0_i32 = arith.constant 0 : i32
    %c0_i32_0 = arith.constant 0 : i32
    %c0_i32_1 = arith.constant 0 : i32
    return %c0_i32, %c0_i32_0 : i32, i32
  }
  func.func @transform_3(%arg0: i32) -> (i32, i32) {
    %c0_i32 = arith.constant 0 : i32
    %c0_i32_0 = arith.constant 0 : i32
    return %arg0, %c0_i32 : i32, i32
  }
}

</mosaic_0001>

<bundles_post_ra>
// kernel: tpu_custom_call.1
= control target key start
LH: loop header
LB: loop body
LE: loop exit
PB: predicated region body
PF: predicated region fallthrough
CT: control target
= control target key end

     0   :  { %8 = vsyncpa [#allocation3], 0  ;;  %s2989_s0 = inlined_call_operand.hbm [shape: f32[8,4096], index: 0, kind: input, shape index: {}]   ;;  %s2990_s1 = inlined_call_operand.hbm [shape: f32[4096,128], index: 1, kind: input, shape index: {}]   ;;  %s2991_s2 = inlined_call_operand.hbm [shape: f32[1,8], index: 2, kind: input, shape index: {}]   ;;  %s2992_s3 = inlined_call_operand.hbm [shape: f32[8,8], index: 3, kind: output, shape index: {}]  }
   0x1   :  { %9 = vsyncpa [#allocation6], 0 }
   0x2   :  { %10 = vsyncpa [#allocation4], 0  ;;  %s2915_s12 = smov [#allocation5]   ;;  %s2821_s16 = scalar_lea.hbm %s2990_s1, 65536 }
   0x3   :  { %s26_s13 = sshll.u32 %s2915_s12, 4  ;;  %p2822_p0 = scmp.ne.s32.totalorder %s2990_s1, %s2821_s16  ;;  %s27_s13 = int_to_ptr.vmem [resolvable:$true] %s26_s13 }
   0x4   :  { %p2825_p1 = scmp.lt.u32.totalorder %s2821_s16, %s2990_s1 }
   0x6   :  { %p2827_p2 = pnand %p2825_p1, %p2822_p0 }
   0x8   :  { %2830 = shalt.err (!%p2827_p2)
}
   0x9   :  { %s2831_s21 = scalar_lea.vmem %s27_s13, 65536  ;;  %p2836_p4 = scmp.lt.s32.totalorder %s27_s13, %s27_s13 }
   0xa   :  { %p2832_p3 = scmp.ne.s32.totalorder %s27_s13, %s2831_s21  ;;  %p2837_p5 = scmp.lt.s32.totalorder %s2831_s21, %s2831_s21 }
   0xc   :  { %p2838_p6 = por %p2837_p5, %p2836_p4 }
   0xe   :  { %p2839_p7 = pnand %p2838_p6, %p2832_p3 }
  0x10   :  { %2842 = shalt.err (!%p2839_p7)
}
  0x11   :  { %s2916_s22 = smov 128   ;;  %s2917_s23 = smov 8  }
  0x12   :  { %32 = dma.hbm_to_vmem [thread:$0]  %s2990_s1, 65536, %s27_s13, [#allocation6], %s2916_s22, %s2916_s22, %s2917_s23  }
  0x13   :  { %s2918_s26 = smov [#allocation2]   ;;  %s2919_s28 = smov [#allocation7]  }
  0x14   :  { %s17_s27 = sshll.u32 %s2918_s26, 4  ;;  %s39_s29 = sshll.u32 %s2919_s28, 4  ;;  %s18_s27 = int_to_ptr.vmem [resolvable:$true] %s17_s27  ;;  %s40_s29 = int_to_ptr.vmem [resolvable:$true] %s39_s29 }
  0x15   :  { %s2843_s5 = scalar_lea.hbm %s2989_s0, 4096 }
  0x16   :  { %p2844_p8 = scmp.ne.s32.totalorder %s2989_s0, %s2843_s5  ;;  %p2847_p9 = scmp.lt.u32.totalorder %s2843_s5, %s2989_s0 }
  0x18   :  { %p2849_p10 = pnand %p2847_p9, %p2844_p8 }
  0x1a   :  { %2852 = shalt.err (!%p2849_p10)
}
  0x1b   :  { %s2853_s1 = scalar_lea.vmem %s18_s27, 4096  ;;  %p2858_p12 = scmp.lt.s32.totalorder %s18_s27, %s18_s27 }
  0x1c   :  { %p2854_p11 = scmp.ne.s32.totalorder %s18_s27, %s2853_s1  ;;  %p2859_p13 = scmp.lt.s32.totalorder %s2853_s1, %s2853_s1 }
  0x1e   :  { %p2860_p0 = por %p2859_p13, %p2858_p12 }
  0x20   :  { %p2861_p1 = pnand %p2860_p0, %p2854_p11 }
  0x22   :  { %2864 = shalt.err (!%p2861_p1)
}
  0x23   :  { %20 = dma.hbm_to_vmem [thread:$0]  %s2989_s0, 4096, %s18_s27, [#allocation3]  }
  0x24   :  { %s2865_s14 = scalar_lea.hbm %s2991_s2, 16 }
  0x25   :  { %p2866_p2 = scmp.ne.s32.totalorder %s2991_s2, %s2865_s14  ;;  %p2869_p3 = scmp.lt.u32.totalorder %s2865_s14, %s2991_s2 }
  0x27   :  { %p2871_p4 = pnand %p2869_p3, %p2866_p2 }
  0x29   :  { %2874 = shalt.err (!%p2871_p4)
}
  0x2a   :  { %s2875_s19 = scalar_lea.vmem %s40_s29, 16  ;;  %s2879_s20 = scalar_lea.vmem %s40_s29, 32 }
  0x2b   :  { %p2876_p5 = scmp.ne.s32.totalorder %s40_s29, %s2875_s19  ;;  %p2880_p6 = scmp.lt.s32.totalorder %s40_s29, %s40_s29 }
  0x2c   :  { %p2881_p7 = scmp.lt.s32.totalorder %s2879_s20, %s2875_s19 }
  0x2e   :  { %p2882_p8 = por %p2881_p7, %p2880_p6 }
  0x30   :  { %p2883_p9 = pnand %p2882_p8, %p2876_p5 }
  0x32   :  { %2886 = shalt.err (!%p2883_p9)
}
  0x33   :  { %42 = dma.hbm_to_vmem [thread:$0]  %s2991_s2, 16, %s40_s29, [#allocation6]  }
  0x34   :  { %2909 = dma.done.wait [#allocation3], 4096  }
  0x35   :  { %2910 = vsyncadd [#allocation3], 4294963200 }
  0x36   :  { %2911 = dma.done.wait [#allocation6], 65552  }
  0x37   :  { %2912 = vsyncadd [#allocation6], 4294901744  ;;  %v100_v0 = vld [vmem:[#allocation5 + $0x80] sm:$0xff]  ;;  %v101_v1 = vld [vmem:[#allocation5 + $0x88] sm:$0xff]  ;;  %s2920_s2 = smov [#allocation8]   ;;  %vm1724_vm0 = vcmask 64512  }
  0x38   :  { %v132_v2 = vld [vmem:[#allocation5 + $0x180] sm:$0xff]  ;;  %v2303_v3 = vpack.c.bf16 %v101_v1, %v100_v0  ;;  %v133_v4 = vld [vmem:[#allocation5 + $0x188] sm:$0xff]  ;;  %v102_v11 = vld [vmem:[#allocation5 + $0x90] sm:$0xff]  ;;  %s1732_s22 = sshll.u32 %s2920_s2, 4  ;;  %s1733_s22 = int_to_ptr.vmem [resolvable:$true] %s1732_s22 }
  0x39   :  { %v84_v5 = vld [vmem:[#allocation5] sm:$0xff]  ;;  %v85_v6 = vld [vmem:[#allocation5 + $0x8] sm:$0xff]  ;;  %v2335_v7 = vpack.c.bf16 %v133_v4, %v132_v2  ;;  %v103_v13 = vld [vmem:[#allocation5 + $0x98] sm:$0xff]  ;;  %s2887_s23 = scalar_lea.vmem %s1733_s22, 128  ;;  %p2892_p11 = scmp.lt.s32.totalorder %s1733_s22, %s1733_s22 }
  0x3a   :  { %v2305_v8 = vpack.c.bf16 %v85_v6, %v84_v5  ;;  %v116_v9 = vld [vmem:[#allocation5 + $0x100] sm:$0xff]  ;;  %v117_v10 = vld [vmem:[#allocation5 + $0x108] sm:$0xff]  ;;  %2304 = vmatprep.subr.bf16.mxu0 %v2303_v3  ;;  %v134_v14 = vld [vmem:[#allocation5 + $0x190] sm:$0xff]  ;;  %v2307_v16 = vpack.c.bf16 %v103_v13, %v102_v11  ;;  %p2888_p10 = scmp.ne.s32.totalorder %s1733_s22, %s2887_s23  ;;  %p2893_p12 = scmp.lt.s32.totalorder %s2887_s23, %s2887_s23 }
  0x3b   :  { %v2337_v12 = vpack.c.bf16 %v117_v10, %v116_v9  ;;  %v135_v15 = vld [vmem:[#allocation5 + $0x198] sm:$0xff]  ;;  %2336 = vmatprep.subr.bf16.mxu1 %v2335_v7  ;;  %v86_v18 = vld [vmem:[#allocation5 + $0x10] sm:$0xff]  ;;  %v104_v23 = vld [vmem:[#allocation5 + $0xa0] sm:$0xff] }
  0x3c   :  { %2306 = vmatpush3.bf16.msra.mxu0 %v2305_v8  ;;  %v2339_v17 = vpack.c.bf16 %v135_v15, %v134_v14  ;;  %v87_v19 = vld [vmem:[#allocation5 + $0x18] sm:$0xff]  ;;  %v118_v20 = vld [vmem:[#allocation5 + $0x110] sm:$0xff]  ;;  %v105_v24 = vld [vmem:[#allocation5 + $0xa8] sm:$0xff]  ;;  %p2894_p13 = por %p2893_p12, %p2892_p11 }
  0x3d   :  { %2338 = vmatpush3.bf16.msra.mxu1 %v2337_v12  ;;  %v2309_v21 = vpack.c.bf16 %v87_v19, %v86_v18  ;;  %v119_v22 = vld [vmem:[#allocation5 + $0x118] sm:$0xff]  ;;  %2308 = vmatprep.subr.bf16.mxu0 %v2307_v16  ;;  %v2311_v26 = vpack.c.bf16 %v105_v24, %v104_v23  ;;  %v136_v27 = vld [vmem:[#allocation5 + $0x1a0] sm:$0xff]  ;;  %v137_v28 = vld [vmem:[#allocation5 + $0x1a8] sm:$0xff] }
  0x3e   :  { %2340 = vmatprep.subr.bf16.mxu1 %v2339_v17  ;;  %v2341_v25 = vpack.c.bf16 %v119_v22, %v118_v20  ;;  %v88_v29 = vld [vmem:[#allocation5 + $0x20] sm:$0xff]  ;;  %v2343_v30 = vpack.c.bf16 %v137_v28, %v136_v27  ;;  %v89_v31 = vld [vmem:[#allocation5 + $0x28] sm:$0xff]  ;;  %v106_v35 = vld [vmem:[#allocation5 + $0xb0] sm:$0xff]  ;;  %p2895_p0 = pnand %p2894_p13, %p2888_p10 }
  0x3f   :  { %v120_v32 = vld [vmem:[#allocation5 + $0x120] sm:$0xff]  ;;  %v121_v33 = vld [vmem:[#allocation5 + $0x128] sm:$0xff]  ;;  %v2313_v34 = vpack.c.bf16 %v89_v31, %v88_v29  ;;  %v107_v36 = vld [vmem:[#allocation5 + $0xb8] sm:$0xff] }
  0x40   :  { %2310 = vmatpush3.bf16.msra.mxu0 %v2309_v21  ;;  %v138_v37 = vld [vmem:[#allocation5 + $0x1b0] sm:$0xff]  ;;  %v2345_v38 = vpack.c.bf16 %v121_v33, %v120_v32  ;;  %v2315_v39 = vpack.c.bf16 %v107_v36, %v106_v35  ;;  %v139_v40 = vld [vmem:[#allocation5 + $0x1b8] sm:$0xff]  ;;  %v108_v46 = vld [vmem:[#allocation5 + $0xc0] sm:$0xff] }
  0x41   :  { %2342 = vmatpush3.bf16.msra.mxu1 %v2341_v25  ;;  %2312 = vmatprep.subr.bf16.mxu0 %v2311_v26  ;;  %v90_v41 = vld [vmem:[#allocation5 + $0x30] sm:$0xff]  ;;  %v91_v42 = vld [vmem:[#allocation5 + $0x38] sm:$0xff]  ;;  %v2347_v43 = vpack.c.bf16 %v139_v40, %v138_v37  ;;  %v109_v47 = vld [vmem:[#allocation5 + $0xc8] sm:$0xff] }
  0x42   :  { %2344 = vmatprep.subr.bf16.mxu1 %v2343_v30  ;;  %v122_v44 = vld [vmem:[#allocation5 + $0x130] sm:$0xff]  ;;  %v123_v45 = vld [vmem:[#allocation5 + $0x138] sm:$0xff]  ;;  %v140_v48 = vld [vmem:[#allocation5 + $0x1c0] sm:$0xff]  ;;  %v2317_v50 = vpack.c.bf16 %v91_v42, %v90_v41  ;;  %v2319_v52 = vpack.c.bf16 %v109_v47, %v108_v46 }
  0x43   :  { %v141_v49 = vld [vmem:[#allocation5 + $0x1c8] sm:$0xff]  ;;  %v2349_v51 = vpack.c.bf16 %v123_v45, %v122_v44  ;;  %v92_v53 = vld [vmem:[#allocation5 + $0x40] sm:$0xff]  ;;  %v110_v58 = vld [vmem:[#allocation5 + $0xd0] sm:$0xff] }
  0x44   :  { %2314 = vmatpush3.bf16.msra.mxu0 %v2313_v34  ;;  %v93_v54 = vld [vmem:[#allocation5 + $0x48] sm:$0xff]  ;;  %v124_v55 = vld [vmem:[#allocation5 + $0x140] sm:$0xff]  ;;  %v2351_v56 = vpack.c.bf16 %v141_v49, %v140_v48  ;;  %v111_v59 = vld [vmem:[#allocation5 + $0xd8] sm:$0xff] }
  0x45   :  { %2346 = vmatpush3.bf16.msra.mxu1 %v2345_v38  ;;  %2316 = vmatprep.subr.bf16.mxu0 %v2315_v39  ;;  %v125_v57 = vld [vmem:[#allocation5 + $0x148] sm:$0xff]  ;;  %v142_v60 = vld [vmem:[#allocation5 + $0x1d0] sm:$0xff]  ;;  %v143_v61 = vld [vmem:[#allocation5 + $0x1d8] sm:$0xff]  ;;  %v2321_v62 = vpack.c.bf16 %v93_v54, %v92_v53  ;;  %v2323_v0 = vpack.c.bf16 %v111_v59, %v110_v58 }
  0x46   :  { %2348 = vmatprep.subr.bf16.mxu1 %v2347_v43  ;;  %v2353_v63 = vpack.c.bf16 %v125_v57, %v124_v55  ;;  %v94_v1 = vld [vmem:[#allocation5 + $0x50] sm:$0xff]  ;;  %v95_v2 = vld [vmem:[#allocation5 + $0x58] sm:$0xff]  ;;  %v2355_v4 = vpack.c.bf16 %v143_v61, %v142_v60  ;;  %v112_v6 = vld [vmem:[#allocation5 + $0xe0] sm:$0xff] }
  0x47   :  { %v126_v3 = vld [vmem:[#allocation5 + $0x150] sm:$0xff]  ;;  %v127_v5 = vld [vmem:[#allocation5 + $0x158] sm:$0xff]  ;;  %v113_v7 = vld [vmem:[#allocation5 + $0xe8] sm:$0xff]  ;;  %v2325_v10 = vpack.c.bf16 %v95_v2, %v94_v1 }
  0x48   :  { %2318 = vmatpush3.bf16.msra.mxu0 %v2317_v50  ;;  %v144_v8 = vld [vmem:[#allocation5 + $0x1e0] sm:$0xff]  ;;  %v145_v9 = vld [vmem:[#allocation5 + $0x1e8] sm:$0xff]  ;;  %v2357_v13 = vpack.c.bf16 %v127_v5, %v126_v3  ;;  %v2327_v14 = vpack.c.bf16 %v113_v7, %v112_v6  ;;  %v55_v17 = vld [vmem:[#allocation2 + $0x18] sm:$0xff] }
  0x49   :  { %2350 = vmatpush3.bf16.msra.mxu1 %v2349_v51  ;;  %2320 = vmatprep.subr.bf16.mxu0 %v2319_v52  ;;  %v96_v11 = vld [vmem:[#allocation5 + $0x60] sm:$0xff]  ;;  %v97_v12 = vld [vmem:[#allocation5 + $0x68] sm:$0xff]  ;;  %v2359_v18 = vpack.c.bf16 %v145_v9, %v144_v8  ;;  %v114_v20 = vld [vmem:[#allocation5 + $0xf0] sm:$0xff] }
  0x4a   :  { %2352 = vmatprep.subr.bf16.mxu1 %v2351_v56  ;;  %v128_v15 = vld [vmem:[#allocation5 + $0x160] sm:$0xff]  ;;  %v53_v16 = vld [vmem:[#allocation2 + $0x8] sm:$0xff]  ;;  %v115_v21 = vld [vmem:[#allocation5 + $0xf8] sm:$0xff]  ;;  %730 = vmatprep.mubr.f32.mxu1 %v55_v17  ;;  %v2329_v24 = vpack.c.bf16 %v97_v12, %v96_v11 }
  0x4b   :  { %v129_v19 = vld [vmem:[#allocation5 + $0x168] sm:$0xff]  ;;  %660 = vmatprep.mubr.f32.mxu0 %v53_v16  ;;  %v146_v22 = vld [vmem:[#allocation5 + $0x1f0] sm:$0xff]  ;;  %v147_v23 = vld [vmem:[#allocation5 + $0x1f8] sm:$0xff]  ;;  %v2331_v26 = vpack.c.bf16 %v115_v21, %v114_v20 }
  0x4c   :  { %2322 = vmatpush3.bf16.msra.mxu0 %v2321_v62  ;;  %v2361_v25 = vpack.c.bf16 %v129_v19, %v128_v15  ;;  %v98_v27 = vld [vmem:[#allocation5 + $0x70] sm:$0xff]  ;;  %v99_v28 = vld [vmem:[#allocation5 + $0x78] sm:$0xff]  ;;  %v2363_v30 = vpack.c.bf16 %v147_v23, %v146_v22  ;;  %v164_v32 = vld [vmem:[#allocation5 + $0x280] sm:$0xff] }
  0x4d   :  { %2354 = vmatpush3.bf16.msra.mxu1 %v2353_v63  ;;  %2324 = vmatprep.subr.bf16.mxu0 %v2323_v0  ;;  %v130_v29 = vld [vmem:[#allocation5 + $0x170] sm:$0xff]  ;;  %v131_v31 = vld [vmem:[#allocation5 + $0x178] sm:$0xff]  ;;  %v165_v33 = vld [vmem:[#allocation5 + $0x288] sm:$0xff]  ;;  %v2333_v36 = vpack.c.bf16 %v99_v28, %v98_v27 }
  0x4e   :  { %2356 = vmatprep.subr.bf16.mxu1 %v2355_v4  ;;  %v196_v34 = vld [vmem:[#allocation5 + $0x380] sm:$0xff]  ;;  %v197_v35 = vld [vmem:[#allocation5 + $0x388] sm:$0xff]  ;;  %v2365_v37 = vpack.c.bf16 %v131_v31, %v130_v29  ;;  %v2367_v38 = vpack.c.bf16 %v165_v33, %v164_v32  ;;  %v166_v44 = vld [vmem:[#allocation5 + $0x290] sm:$0xff] }
  0x4f   :  { %v148_v39 = vld [vmem:[#allocation5 + $0x200] sm:$0xff]  ;;  %v149_v40 = vld [vmem:[#allocation5 + $0x208] sm:$0xff]  ;;  %v2399_v42 = vpack.c.bf16 %v197_v35, %v196_v34  ;;  %v167_v45 = vld [vmem:[#allocation5 + $0x298] sm:$0xff] }
  0x50   :  { %2326 = vmatpush3.bf16.msra.mxu0 %v2325_v10  ;;  %v180_v41 = vld [vmem:[#allocation5 + $0x300] sm:$0xff]  ;;  %v181_v43 = vld [vmem:[#allocation5 + $0x308] sm:$0xff]  ;;  %v198_v46 = vld [vmem:[#allocation5 + $0x390] sm:$0xff]  ;;  %v2369_v50 = vpack.c.bf16 %v149_v40, %v148_v39  ;;  %v2371_v52 = vpack.c.bf16 %v167_v45, %v166_v44 }
  0x51   :  { %2358 = vmatpush3.bf16.msra.mxu1 %v2357_v13  ;;  %2328 = vmatprep.subr.bf16.mxu0 %v2327_v14  ;;  %v199_v47 = vld [vmem:[#allocation5 + $0x398] sm:$0xff]  ;;  %v52_v48 = vld [vmem:[#allocation2] sm:$0xff]  ;;  %v54_v49 = vld [vmem:[#allocation2 + $0x10] sm:$0xff]  ;;  %v2401_v51 = vpack.c.bf16 %v181_v43, %v180_v41 }
  0x52   :  { %2360 = vmatprep.subr.bf16.mxu1 %v2359_v18  ;;  %v150_v53 = vld [vmem:[#allocation5 + $0x210] sm:$0xff]  ;;  %v151_v54 = vld [vmem:[#allocation5 + $0x218] sm:$0xff]  ;;  %v2403_v56 = vpack.c.bf16 %v199_v47, %v198_v46  ;;  %v168_v58 = vld [vmem:[#allocation5 + $0x2a0] sm:$0xff] }
  0x53   :  { %v182_v55 = vld [vmem:[#allocation5 + $0x310] sm:$0xff]  ;;  %v183_v57 = vld [vmem:[#allocation5 + $0x318] sm:$0xff]  ;;  %v169_v59 = vld [vmem:[#allocation5 + $0x2a8] sm:$0xff]  ;;  %v2373_v62 = vpack.c.bf16 %v151_v54, %v150_v53 }
  0x54   :  { %2330 = vmatpush3.bf16.msra.mxu0 %v2329_v24  ;;  %v200_v60 = vld [vmem:[#allocation5 + $0x3a0] sm:$0xff]  ;;  %v201_v61 = vld [vmem:[#allocation5 + $0x3a8] sm:$0xff]  ;;  %v2405_v63 = vpack.c.bf16 %v183_v57, %v182_v55  ;;  %v2375_v0 = vpack.c.bf16 %v169_v59, %v168_v58  ;;  %v170_v6 = vld [vmem:[#allocation5 + $0x2b0] sm:$0xff] }
  0x55   :  { %2362 = vmatpush3.bf16.msra.mxu1 %v2361_v25  ;;  %2332 = vmatprep.subr.bf16.mxu0 %v2331_v26  ;;  %v152_v1 = vld [vmem:[#allocation5 + $0x220] sm:$0xff]  ;;  %v153_v2 = vld [vmem:[#allocation5 + $0x228] sm:$0xff]  ;;  %v2407_v4 = vpack.c.bf16 %v201_v61, %v200_v60  ;;  %v171_v7 = vld [vmem:[#allocation5 + $0x2b8] sm:$0xff] }
  0x56   :  { %2364 = vmatprep.subr.bf16.mxu1 %v2363_v30  ;;  %v184_v3 = vld [vmem:[#allocation5 + $0x320] sm:$0xff]  ;;  %v185_v5 = vld [vmem:[#allocation5 + $0x328] sm:$0xff]  ;;  %v202_v8 = vld [vmem:[#allocation5 + $0x3b0] sm:$0xff]  ;;  %v2377_v10 = vpack.c.bf16 %v153_v2, %v152_v1  ;;  %v2379_v12 = vpack.c.bf16 %v171_v7, %v170_v6 }
  0x57   :  { %v203_v9 = vld [vmem:[#allocation5 + $0x3b8] sm:$0xff]  ;;  %v2409_v11 = vpack.c.bf16 %v185_v5, %v184_v3  ;;  %v154_v13 = vld [vmem:[#allocation5 + $0x230] sm:$0xff]  ;;  %v172_v18 = vld [vmem:[#allocation5 + $0x2c0] sm:$0xff] }
  0x58   :  { %2334 = vmatpush3.bf16.msra.mxu0 %v2333_v36  ;;  %v155_v14 = vld [vmem:[#allocation5 + $0x238] sm:$0xff]  ;;  %v186_v15 = vld [vmem:[#allocation5 + $0x330] sm:$0xff]  ;;  %v2411_v16 = vpack.c.bf16 %v203_v9, %v202_v8  ;;  %v173_v19 = vld [vmem:[#allocation5 + $0x2c8] sm:$0xff] }
  0x59   :  { %2366 = vmatpush3.bf16.msra.mxu1 %v2365_v37  ;;  %2368 = vmatprep.subr.bf16.mxu0 %v2367_v38  ;;  %v187_v17 = vld [vmem:[#allocation5 + $0x338] sm:$0xff]  ;;  %v204_v20 = vld [vmem:[#allocation5 + $0x3c0] sm:$0xff]  ;;  %v205_v21 = vld [vmem:[#allocation5 + $0x3c8] sm:$0xff]  ;;  %v2381_v22 = vpack.c.bf16 %v155_v14, %v154_v13  ;;  %v2383_v26 = vpack.c.bf16 %v173_v19, %v172_v18 }
  0x5a   :  { %2400 = vmatprep.subr.bf16.mxu1 %v2399_v42  ;;  %v156_v23 = vld [vmem:[#allocation5 + $0x240] sm:$0xff]  ;;  %v57_v24 = vld [vmem:[#allocation2 + $0x28] sm:$0xff]  ;;  %v2413_v25 = vpack.c.bf16 %v187_v17, %v186_v15  ;;  %v59_v29 = vld [vmem:[#allocation2 + $0x38] sm:$0xff]  ;;  %v2415_v30 = vpack.c.bf16 %v205_v21, %v204_v20 }
  0x5b   :  { %661 = vmatmul.mubr.f32.vlgmr.msra.gmra.mrb[0].mxu0 %v52_v48  ;;  %v157_v27 = vld [vmem:[#allocation5 + $0x248] sm:$0xff]  ;;  %v188_v28 = vld [vmem:[#allocation5 + $0x340] sm:$0xff]  ;;  %v174_v32 = vld [vmem:[#allocation5 + $0x2d0] sm:$0xff] }
  0x5c   :  { %731 = vmatmul.mubr.f32.vlgmr.msra.gmra.mrb[0].mxu1 %v54_v49  ;;  %2370 = vmatpush3.bf16.msra.mxu0 %v2369_v50  ;;  %v189_v31 = vld [vmem:[#allocation5 + $0x348] sm:$0xff]  ;;  %v175_v33 = vld [vmem:[#allocation5 + $0x2d8] sm:$0xff]  ;;  %v206_v34 = vld [vmem:[#allocation5 + $0x3d0] sm:$0xff]  ;;  %v2385_v36 = vpack.c.bf16 %v157_v27, %v156_v23 }
  0x5d   :  { %2402 = vmatpush3.bf16.msra.mxu1 %v2401_v51  ;;  %2372 = vmatprep.subr.bf16.mxu0 %v2371_v52  ;;  %v207_v35 = vld [vmem:[#allocation5 + $0x3d8] sm:$0xff]  ;;  %v2417_v37 = vpack.c.bf16 %v189_v31, %v188_v28  ;;  %v2387_v38 = vpack.c.bf16 %v175_v33, %v174_v32  ;;  %v158_v39 = vld [vmem:[#allocation5 + $0x250] sm:$0xff]  ;;  %v176_v44 = vld [vmem:[#allocation5 + $0x2e0] sm:$0xff] }
  0x5e   :  { %2404 = vmatprep.subr.bf16.mxu1 %v2403_v56  ;;  %800 = vmatprep.mubr.f32.mxu0 %v57_v24  ;;  %v159_v40 = vld [vmem:[#allocation5 + $0x258] sm:$0xff]  ;;  %v190_v41 = vld [vmem:[#allocation5 + $0x350] sm:$0xff]  ;;  %v2419_v42 = vpack.c.bf16 %v207_v35, %v206_v34  ;;  %v177_v45 = vld [vmem:[#allocation5 + $0x2e8] sm:$0xff] }
  0x5f   :  { %870 = vmatprep.mubr.f32.mxu1 %v59_v29  ;;  %v191_v43 = vld [vmem:[#allocation5 + $0x358] sm:$0xff]  ;;  %v208_v46 = vld [vmem:[#allocation5 + $0x3e0] sm:$0xff]  ;;  %v209_v47 = vld [vmem:[#allocation5 + $0x3e8] sm:$0xff]  ;;  %v2389_v48 = vpack.c.bf16 %v159_v40, %v158_v39  ;;  %v2391_v50 = vpack.c.bf16 %v177_v45, %v176_v44 }
  0x60   :  { %2374 = vmatpush3.bf16.msra.mxu0 %v2373_v62  ;;  %v2421_v49 = vpack.c.bf16 %v191_v43, %v190_v41  ;;  %v160_v51 = vld [vmem:[#allocation5 + $0x260] sm:$0xff]  ;;  %v161_v52 = vld [vmem:[#allocation5 + $0x268] sm:$0xff]  ;;  %v2423_v54 = vpack.c.bf16 %v209_v47, %v208_v46  ;;  %v178_v56 = vld [vmem:[#allocation5 + $0x2f0] sm:$0xff] }
  0x61   :  { %2406 = vmatpush3.bf16.msra.mxu1 %v2405_v63  ;;  %2376 = vmatprep.subr.bf16.mxu0 %v2375_v0  ;;  %v192_v53 = vld [vmem:[#allocation5 + $0x360] sm:$0xff]  ;;  %v193_v55 = vld [vmem:[#allocation5 + $0x368] sm:$0xff]  ;;  %v179_v57 = vld [vmem:[#allocation5 + $0x2f8] sm:$0xff]  ;;  %v2393_v60 = vpack.c.bf16 %v161_v52, %v160_v51 }
  0x62   :  { %2408 = vmatprep.subr.bf16.mxu1 %v2407_v4  ;;  %v210_v58 = vld [vmem:[#allocation5 + $0x3f0] sm:$0xff]  ;;  %v211_v59 = vld [vmem:[#allocation5 + $0x3f8] sm:$0xff]  ;;  %v2425_v61 = vpack.c.bf16 %v193_v55, %v192_v53  ;;  %v2395_v62 = vpack.c.bf16 %v179_v57, %v178_v56  ;;  %v228_v4 = vld [vmem:[#allocation5 + $0x480] sm:$0xff] }
  0x63   :  { %v162_v63 = vld [vmem:[#allocation5 + $0x270] sm:$0xff]  ;;  %v163_v0 = vld [vmem:[#allocation5 + $0x278] sm:$0xff]  ;;  %v2427_v2 = vpack.c.bf16 %v211_v59, %v210_v58  ;;  %v229_v5 = vld [vmem:[#allocation5 + $0x488] sm:$0xff] }
  0x64   :  { %2378 = vmatpush3.bf16.msra.mxu0 %v2377_v10  ;;  %v194_v1 = vld [vmem:[#allocation5 + $0x370] sm:$0xff]  ;;  %v195_v3 = vld [vmem:[#allocation5 + $0x378] sm:$0xff]  ;;  %v260_v6 = vld [vmem:[#allocation5 + $0x580] sm:$0xff]  ;;  %v2397_v8 = vpack.c.bf16 %v163_v0, %v162_v63  ;;  %v2431_v10 = vpack.c.bf16 %v229_v5, %v228_v4 }
  0x65   :  { %2410 = vmatpush3.bf16.msra.mxu1 %v2409_v11  ;;  %2380 = vmatprep.subr.bf16.mxu0 %v2379_v12  ;;  %v261_v7 = vld [vmem:[#allocation5 + $0x588] sm:$0xff]  ;;  %v2429_v9 = vpack.c.bf16 %v195_v3, %v194_v1  ;;  %v212_v11 = vld [vmem:[#allocation5 + $0x400] sm:$0xff]  ;;  %v231_v17 = vld [vmem:[#allocation5 + $0x498] sm:$0xff] }
  0x66   :  { %2412 = vmatprep.subr.bf16.mxu1 %v2411_v16  ;;  %v213_v12 = vld [vmem:[#allocation5 + $0x408] sm:$0xff]  ;;  %v244_v13 = vld [vmem:[#allocation5 + $0x500] sm:$0xff]  ;;  %v2463_v14 = vpack.c.bf16 %v261_v7, %v260_v6  ;;  %v230_v16 = vld [vmem:[#allocation5 + $0x490] sm:$0xff] }
  0x67   :  { %v245_v15 = vld [vmem:[#allocation5 + $0x508] sm:$0xff]  ;;  %v262_v18 = vld [vmem:[#allocation5 + $0x590] sm:$0xff]  ;;  %v263_v19 = vld [vmem:[#allocation5 + $0x598] sm:$0xff]  ;;  %v2433_v21 = vpack.c.bf16 %v213_v12, %v212_v11  ;;  %v2435_v24 = vpack.c.bf16 %v231_v17, %v230_v16 }
  0x68   :  { %2382 = vmatpush3.bf16.msra.mxu0 %v2381_v22  ;;  %v56_v20 = vld [vmem:[#allocation2 + $0x20] sm:$0xff]  ;;  %v58_v22 = vld [vmem:[#allocation2 + $0x30] sm:$0xff]  ;;  %v2465_v23 = vpack.c.bf16 %v245_v15, %v244_v13  ;;  %v2467_v28 = vpack.c.bf16 %v263_v19, %v262_v18  ;;  %v247_v29 = vld [vmem:[#allocation5 + $0x518] sm:$0xff] }
  0x69   :  { %2414 = vmatpush3.bf16.msra.mxu1 %v2413_v25  ;;  %2384 = vmatprep.subr.bf16.mxu0 %v2383_v26  ;;  %v214_v25 = vld [vmem:[#allocation5 + $0x410] sm:$0xff]  ;;  %v215_v26 = vld [vmem:[#allocation5 + $0x418] sm:$0xff]  ;;  %v233_v31 = vld [vmem:[#allocation5 + $0x4a8] sm:$0xff] }
  0x6a   :  { %2416 = vmatprep.subr.bf16.mxu1 %v2415_v30  ;;  %v246_v27 = vld [vmem:[#allocation5 + $0x510] sm:$0xff]  ;;  %v232_v30 = vld [vmem:[#allocation5 + $0x4a0] sm:$0xff]  ;;  %v265_v33 = vld [vmem:[#allocation5 + $0x5a8] sm:$0xff]  ;;  %v2437_v35 = vpack.c.bf16 %v215_v26, %v214_v25 }
  0x6b   :  { %v264_v32 = vld [vmem:[#allocation5 + $0x5a0] sm:$0xff]  ;;  %v61_v34 = vld [vmem:[#allocation2 + $0x48] sm:$0xff]  ;;  %v234_v44 = vld [vmem:[#allocation5 + $0x4b0] sm:$0xff] }
  0x6c   :  { %2386 = vmatpush3.bf16.msra.mxu0 %v2385_v36  ;;  %v63_v36 = vld [vmem:[#allocation2 + $0x58] sm:$0xff]  ;;  %v216_v39 = vld [vmem:[#allocation5 + $0x420] sm:$0xff]  ;;  %v217_v40 = vld [vmem:[#allocation5 + $0x428] sm:$0xff] }
  0x6d   :  { %2418 = vmatpush3.bf16.msra.mxu1 %v2417_v37  ;;  %2388 = vmatprep.subr.bf16.mxu0 %v2387_v38  ;;  %v2469_v37 = vpack.c.bf16 %v247_v29, %v246_v27  ;;  %v2439_v38 = vpack.c.bf16 %v233_v31, %v232_v30  ;;  %v248_v41 = vld [vmem:[#allocation5 + $0x520] sm:$0xff]  ;;  %v249_v43 = vld [vmem:[#allocation5 + $0x528] sm:$0xff]  ;;  %v235_v45 = vld [vmem:[#allocation5 + $0x4b8] sm:$0xff] }
  0x6e   :  { %2420 = vmatprep.subr.bf16.mxu1 %v2419_v42  ;;  %v2471_v42 = vpack.c.bf16 %v265_v33, %v264_v32  ;;  %v266_v46 = vld [vmem:[#allocation5 + $0x5b0] sm:$0xff]  ;;  %v267_v47 = vld [vmem:[#allocation5 + $0x5b8] sm:$0xff]  ;;  %v236_v56 = vld [vmem:[#allocation5 + $0x4c0] sm:$0xff] }
  0x6f   :  { %v218_v51 = vld [vmem:[#allocation5 + $0x430] sm:$0xff]  ;;  %v219_v52 = vld [vmem:[#allocation5 + $0x438] sm:$0xff]  ;;  %v237_v57 = vld [vmem:[#allocation5 + $0x4c8] sm:$0xff] }
  0x70   :  { %2390 = vmatpush3.bf16.msra.mxu0 %v2389_v48  ;;  %v2441_v48 = vpack.c.bf16 %v217_v40, %v216_v39  ;;  %v250_v53 = vld [vmem:[#allocation5 + $0x530] sm:$0xff]  ;;  %v251_v55 = vld [vmem:[#allocation5 + $0x538] sm:$0xff]  ;;  %v268_v58 = vld [vmem:[#allocation5 + $0x5c0] sm:$0xff] }
  0x71   :  { %2422 = vmatpush3.bf16.msra.mxu1 %v2421_v49  ;;  %2392 = vmatprep.subr.bf16.mxu0 %v2391_v50  ;;  %v2473_v49 = vpack.c.bf16 %v249_v43, %v248_v41  ;;  %v2443_v50 = vpack.c.bf16 %v235_v45, %v234_v44  ;;  %v269_v59 = vld [vmem:[#allocation5 + $0x5c8] sm:$0xff]  ;;  %v220_v63 = vld [vmem:[#allocation5 + $0x440] sm:$0xff]  ;;  %v238_v4 = vld [vmem:[#allocation5 + $0x4d0] sm:$0xff] }
  0x72   :  { %2424 = vmatprep.subr.bf16.mxu1 %v2423_v54  ;;  %v2475_v54 = vpack.c.bf16 %v267_v47, %v266_v46  ;;  %v221_v0 = vld [vmem:[#allocation5 + $0x448] sm:$0xff]  ;;  %v252_v1 = vld [vmem:[#allocation5 + $0x540] sm:$0xff]  ;;  %v239_v5 = vld [vmem:[#allocation5 + $0x4d8] sm:$0xff] }
  0x73   :  { %v253_v3 = vld [vmem:[#allocation5 + $0x548] sm:$0xff]  ;;  %v270_v6 = vld [vmem:[#allocation5 + $0x5d0] sm:$0xff]  ;;  %v271_v7 = vld [vmem:[#allocation5 + $0x5d8] sm:$0xff] }
  0x74   :  { %2394 = vmatpush3.bf16.msra.mxu0 %v2393_v60  ;;  %v2445_v60 = vpack.c.bf16 %v219_v52, %v218_v51  ;;  %v222_v11 = vld [vmem:[#allocation5 + $0x450] sm:$0xff]  ;;  %v223_v12 = vld [vmem:[#allocation5 + $0x458] sm:$0xff]  ;;  %v240_v16 = vld [vmem:[#allocation5 + $0x4e0] sm:$0xff] }
  0x75   :  { %2426 = vmatpush3.bf16.msra.mxu1 %v2425_v61  ;;  %2396 = vmatprep.subr.bf16.mxu0 %v2395_v62  ;;  %v2477_v61 = vpack.c.bf16 %v251_v55, %v250_v53  ;;  %v2447_v62 = vpack.c.bf16 %v237_v57, %v236_v56  ;;  %v254_v13 = vld [vmem:[#allocation5 + $0x550] sm:$0xff]  ;;  %v255_v15 = vld [vmem:[#allocation5 + $0x558] sm:$0xff]  ;;  %v241_v17 = vld [vmem:[#allocation5 + $0x4e8] sm:$0xff] }
  0x76   :  { %2428 = vmatprep.subr.bf16.mxu1 %v2427_v2  ;;  %v2479_v2 = vpack.c.bf16 %v269_v59, %v268_v58  ;;  %v272_v18 = vld [vmem:[#allocation5 + $0x5e0] sm:$0xff]  ;;  %v273_v19 = vld [vmem:[#allocation5 + $0x5e8] sm:$0xff]  ;;  %v243_v29 = vld [vmem:[#allocation5 + $0x4f8] sm:$0xff] }
  0x77   :  { %v256_v25 = vld [vmem:[#allocation5 + $0x560] sm:$0xff]  ;;  %v2487_v26 = vpack.c.bf16 %v273_v19, %v272_v18  ;;  %v257_v27 = vld [vmem:[#allocation5 + $0x568] sm:$0xff]  ;;  %v274_v30 = vld [vmem:[#allocation5 + $0x5f0] sm:$0xff] }
  0x78   :  { %2398 = vmatpush3.bf16.msra.mxu0 %v2397_v8  ;;  %v2449_v8 = vpack.c.bf16 %v221_v0, %v220_v63  ;;  %v275_v31 = vld [vmem:[#allocation5 + $0x5f8] sm:$0xff]  ;;  %v2489_v33 = vpack.c.bf16 %v257_v27, %v256_v25  ;;  %v292_v40 = vld [vmem:[#allocation5 + $0x680] sm:$0xff]  ;;  %v293_v41 = vld [vmem:[#allocation5 + $0x688] sm:$0xff] }
  0x79   :  { %2430 = vmatpush3.bf16.msra.mxu1 %v2429_v9  ;;  %2432 = vmatprep.subr.bf16.mxu0 %v2431_v10  ;;  %v2481_v9 = vpack.c.bf16 %v253_v3, %v252_v1  ;;  %v2451_v10 = vpack.c.bf16 %v239_v5, %v238_v4  ;;  %v259_v39 = vld [vmem:[#allocation5 + $0x578] sm:$0xff]  ;;  %v325_v43 = vld [vmem:[#allocation5 + $0x788] sm:$0xff]  ;;  %v2495_v46 = vpack.c.bf16 %v293_v41, %v292_v40  ;;  %v276_v47 = vld [vmem:[#allocation5 + $0x600] sm:$0xff] }
  0x7a   :  { %2464 = vmatprep.subr.bf16.mxu1 %v2463_v14  ;;  %v2483_v14 = vpack.c.bf16 %v271_v7, %v270_v6  ;;  %v309_v51 = vld [vmem:[#allocation5 + $0x708] sm:$0xff]  ;;  %v294_v52 = vld [vmem:[#allocation5 + $0x690] sm:$0xff]  ;;  %v295_v53 = vld [vmem:[#allocation5 + $0x698] sm:$0xff] }
  0x7b   :  { %801 = vmatmul.mubr.f32.vlgmr.msra.gmra.mrb[2].mxu0 %v56_v20  ;;  %v2453_v20 = vpack.c.bf16 %v223_v12, %v222_v11  ;;  %v327_v55 = vld [vmem:[#allocation5 + $0x798] sm:$0xff]  ;;  %v60_v56 = vld [vmem:[#allocation2 + $0x40] sm:$0xff]  ;;  %v62_v58 = vld [vmem:[#allocation2 + $0x50] sm:$0xff] }
  0x7c   :  { %2434 = vmatpush3.bf16.msra.mxu0 %v2433_v21  ;;  %871 = vmatmul.mubr.f32.vlgmr.msra.gmra.mrb[2].mxu1 %v58_v22  ;;  %v2485_v21 = vpack.c.bf16 %v255_v15, %v254_v13  ;;  %v2455_v22 = vpack.c.bf16 %v241_v17, %v240_v16  ;;  %v310_v63 = vld [vmem:[#allocation5 + $0x710] sm:$0xff]  ;;  %v311_v1 = vld [vmem:[#allocation5 + $0x718] sm:$0xff]  ;;  %v297_v3 = vld [vmem:[#allocation5 + $0x6a8] sm:$0xff] }
  0x7d   :  { %2466 = vmatpush3.bf16.msra.mxu1 %v2465_v23  ;;  %2436 = vmatprep.subr.bf16.mxu0 %v2435_v24  ;;  %v224_v23 = vld [vmem:[#allocation5 + $0x460] sm:$0xff]  ;;  %v225_v24 = vld [vmem:[#allocation5 + $0x468] sm:$0xff]  ;;  %v298_v16 = vld [vmem:[#allocation5 + $0x6b0] sm:$0xff] }
  0x7e   :  { %2468 = vmatprep.subr.bf16.mxu1 %v2467_v28  ;;  %940 = vmatprep.mubr.f32.mxu0 %v61_v34  ;;  %v242_v28 = vld [vmem:[#allocation5 + $0x4f0] sm:$0xff]  ;;  %v2457_v32 = vpack.c.bf16 %v225_v24, %v224_v23  ;;  %v328_v4 = vld [vmem:[#allocation5 + $0x7a0] sm:$0xff]  ;;  %v329_v5 = vld [vmem:[#allocation5 + $0x7a8] sm:$0xff] }
  0x7f   :  { %1010 = vmatprep.mubr.f32.mxu1 %v63_v36  ;;  %v2459_v34 = vpack.c.bf16 %v243_v29, %v242_v28  ;;  %v227_v36 = vld [vmem:[#allocation5 + $0x478] sm:$0xff]  ;;  %v65_v6 = vld [vmem:[#allocation2 + $0x68] sm:$0xff]  ;;  %v280_v11 = vld [vmem:[#allocation5 + $0x620] sm:$0xff] }
  0x80   :  { %2438 = vmatpush3.bf16.msra.mxu0 %v2437_v35  ;;  %v226_v35 = vld [vmem:[#allocation5 + $0x470] sm:$0xff]  ;;  %v281_v12 = vld [vmem:[#allocation5 + $0x628] sm:$0xff]  ;;  %v312_v13 = vld [vmem:[#allocation5 + $0x720] sm:$0xff] }
  0x81   :  { %2470 = vmatpush3.bf16.msra.mxu1 %v2469_v37  ;;  %2440 = vmatprep.subr.bf16.mxu0 %v2439_v38  ;;  %v258_v37 = vld [vmem:[#allocation5 + $0x570] sm:$0xff]  ;;  %v2491_v38 = vpack.c.bf16 %v275_v31, %v274_v30  ;;  %v2461_v44 = vpack.c.bf16 %v227_v36, %v226_v35  ;;  %v313_v15 = vld [vmem:[#allocation5 + $0x728] sm:$0xff]  ;;  %v299_v17 = vld [vmem:[#allocation5 + $0x6b8] sm:$0xff] }
  0x82   :  { %2472 = vmatprep.subr.bf16.mxu1 %v2471_v42  ;;  %v324_v42 = vld [vmem:[#allocation5 + $0x780] sm:$0xff]  ;;  %v2493_v45 = vpack.c.bf16 %v259_v39, %v258_v37  ;;  %v330_v18 = vld [vmem:[#allocation5 + $0x7b0] sm:$0xff]  ;;  %v331_v19 = vld [vmem:[#allocation5 + $0x7b8] sm:$0xff] }
  0x83   :  { %v282_v23 = vld [vmem:[#allocation5 + $0x630] sm:$0xff]  ;;  %v283_v24 = vld [vmem:[#allocation5 + $0x638] sm:$0xff]  ;;  %v300_v28 = vld [vmem:[#allocation5 + $0x6c0] sm:$0xff] }
  0x84   :  { %2442 = vmatpush3.bf16.msra.mxu0 %v2441_v48  ;;  %v277_v48 = vld [vmem:[#allocation5 + $0x608] sm:$0xff]  ;;  %v314_v25 = vld [vmem:[#allocation5 + $0x730] sm:$0xff]  ;;  %v315_v27 = vld [vmem:[#allocation5 + $0x738] sm:$0xff] }
  0x85   :  { %2474 = vmatpush3.bf16.msra.mxu1 %v2473_v49  ;;  %2444 = vmatprep.subr.bf16.mxu0 %v2443_v50  ;;  %v308_v49 = vld [vmem:[#allocation5 + $0x700] sm:$0xff]  ;;  %v2527_v50 = vpack.c.bf16 %v325_v43, %v324_v42  ;;  %v2497_v57 = vpack.c.bf16 %v277_v48, %v276_v47  ;;  %v301_v29 = vld [vmem:[#allocation5 + $0x6c8] sm:$0xff]  ;;  %v302_v40 = vld [vmem:[#allocation5 + $0x6d0] sm:$0xff] }
  0x86   :  { %2476 = vmatprep.subr.bf16.mxu1 %v2475_v54  ;;  %v326_v54 = vld [vmem:[#allocation5 + $0x790] sm:$0xff]  ;;  %v2529_v59 = vpack.c.bf16 %v309_v51, %v308_v49  ;;  %v332_v30 = vld [vmem:[#allocation5 + $0x7c0] sm:$0xff]  ;;  %v333_v31 = vld [vmem:[#allocation5 + $0x7c8] sm:$0xff] }
  0x87   :  { %v2531_v0 = vpack.c.bf16 %v327_v55, %v326_v54  ;;  %v284_v35 = vld [vmem:[#allocation5 + $0x640] sm:$0xff]  ;;  %v285_v36 = vld [vmem:[#allocation5 + $0x648] sm:$0xff]  ;;  %v303_v41 = vld [vmem:[#allocation5 + $0x6d8] sm:$0xff] }
  0x88   :  { %2446 = vmatpush3.bf16.msra.mxu0 %v2445_v60  ;;  %v2499_v60 = vpack.c.bf16 %v295_v53, %v294_v52  ;;  %v316_v37 = vld [vmem:[#allocation5 + $0x740] sm:$0xff]  ;;  %v317_v39 = vld [vmem:[#allocation5 + $0x748] sm:$0xff]  ;;  %v334_v42 = vld [vmem:[#allocation5 + $0x7d0] sm:$0xff] }
  0x89   :  { %2478 = vmatpush3.bf16.msra.mxu1 %v2477_v61  ;;  %2448 = vmatprep.subr.bf16.mxu0 %v2447_v62  ;;  %v278_v61 = vld [vmem:[#allocation5 + $0x610] sm:$0xff]  ;;  %v279_v62 = vld [vmem:[#allocation5 + $0x618] sm:$0xff]  ;;  %v304_v52 = vld [vmem:[#allocation5 + $0x6e0] sm:$0xff] }
  0x8a   :  { %2480 = vmatprep.subr.bf16.mxu1 %v2479_v2  ;;  %v296_v2 = vld [vmem:[#allocation5 + $0x6a0] sm:$0xff]  ;;  %v2501_v7 = vpack.c.bf16 %v279_v62, %v278_v61  ;;  %v335_v43 = vld [vmem:[#allocation5 + $0x7d8] sm:$0xff]  ;;  %v286_v47 = vld [vmem:[#allocation5 + $0x650] sm:$0xff] }
  0x8b   :  { %v287_v48 = vld [vmem:[#allocation5 + $0x658] sm:$0xff]  ;;  %v318_v49 = vld [vmem:[#allocation5 + $0x750] sm:$0xff]  ;;  %v305_v53 = vld [vmem:[#allocation5 + $0x6e8] sm:$0xff] }
  0x8c   :  { %2450 = vmatpush3.bf16.msra.mxu0 %v2449_v8  ;;  %v67_v8 = vld [vmem:[#allocation2 + $0x78] sm:$0xff]  ;;  %v336_v54 = vld [vmem:[#allocation5 + $0x7e0] sm:$0xff]  ;;  %v337_v55 = vld [vmem:[#allocation5 + $0x7e8] sm:$0xff] }
  0x8d   :  { %2482 = vmatpush3.bf16.msra.mxu1 %v2481_v9  ;;  %2452 = vmatprep.subr.bf16.mxu0 %v2451_v10  ;;  %v2533_v9 = vpack.c.bf16 %v311_v1, %v310_v63  ;;  %v2503_v10 = vpack.c.bf16 %v297_v3, %v296_v2  ;;  %v319_v51 = vld [vmem:[#allocation5 + $0x758] sm:$0xff]  ;;  %v320_v61 = vld [vmem:[#allocation5 + $0x760] sm:$0xff]  ;;  %v2551_v62 = vpack.c.bf16 %v337_v55, %v336_v54  ;;  %v321_v63 = vld [vmem:[#allocation5 + $0x768] sm:$0xff] }
  0x8e   :  { %2484 = vmatprep.subr.bf16.mxu1 %v2483_v14  ;;  %v2535_v14 = vpack.c.bf16 %v329_v5, %v328_v4  ;;  %v307_v1 = vld [vmem:[#allocation5 + $0x6f8] sm:$0xff]  ;;  %v338_v2 = vld [vmem:[#allocation5 + $0x7f0] sm:$0xff]  ;;  %v2553_v5 = vpack.c.bf16 %v321_v63, %v320_v61 }
  0x8f   :  { %v339_v3 = vld [vmem:[#allocation5 + $0x7f8] sm:$0xff]  ;;  %v394_v54 = vld [vmem:[#allocation5 + $0x9b0] sm:$0xff] }
  0x90   :  { %2454 = vmatpush3.bf16.msra.mxu0 %v2453_v20  ;;  %v2505_v20 = vpack.c.bf16 %v281_v12, %v280_v11  ;;  %v323_v11 = vld [vmem:[#allocation5 + $0x778] sm:$0xff]  ;;  %v356_v12 = vld [vmem:[#allocation5 + $0x880] sm:$0xff]  ;;  %v378_v61 = vld [vmem:[#allocation5 + $0x930] sm:$0xff] }
  0x91   :  { %2486 = vmatpush3.bf16.msra.mxu1 %v2485_v21  ;;  %2456 = vmatprep.subr.bf16.mxu0 %v2455_v22  ;;  %v2537_v21 = vpack.c.bf16 %v313_v15, %v312_v13  ;;  %v2507_v22 = vpack.c.bf16 %v299_v17, %v298_v16  ;;  %v357_v13 = vld [vmem:[#allocation5 + $0x888] sm:$0xff]  ;;  %v395_v55 = vld [vmem:[#allocation5 + $0x9b8] sm:$0xff] }
  0x92   :  { %2488 = vmatprep.subr.bf16.mxu1 %v2487_v26  ;;  %v2539_v26 = vpack.c.bf16 %v331_v19, %v330_v18  ;;  %v389_v15 = vld [vmem:[#allocation5 + $0x988] sm:$0xff]  ;;  %v2559_v18 = vpack.c.bf16 %v357_v13, %v356_v12  ;;  %v340_v19 = vld [vmem:[#allocation5 + $0x800] sm:$0xff]  ;;  %v379_v63 = vld [vmem:[#allocation5 + $0x938] sm:$0xff] }
  0x93   :  { %v366_v12 = vld [vmem:[#allocation5 + $0x8d0] sm:$0xff]  ;;  %v367_v13 = vld [vmem:[#allocation5 + $0x8d8] sm:$0xff] }
  0x94   :  { %2458 = vmatpush3.bf16.msra.mxu0 %v2457_v32  ;;  %v2509_v32 = vpack.c.bf16 %v283_v24, %v282_v23  ;;  %v373_v23 = vld [vmem:[#allocation5 + $0x908] sm:$0xff]  ;;  %v358_v24 = vld [vmem:[#allocation5 + $0x890] sm:$0xff] }
  0x95   :  { %2490 = vmatpush3.bf16.msra.mxu1 %v2489_v33  ;;  %2460 = vmatprep.subr.bf16.mxu0 %v2459_v34  ;;  %v2541_v33 = vpack.c.bf16 %v315_v27, %v314_v25  ;;  %v2511_v34 = vpack.c.bf16 %v301_v29, %v300_v28  ;;  %v359_v25 = vld [vmem:[#allocation5 + $0x898] sm:$0xff]  ;;  %v64_v28 = vld [vmem:[#allocation2 + $0x60] sm:$0xff] }
  0x96   :  { %2492 = vmatprep.subr.bf16.mxu1 %v2491_v38  ;;  %v2543_v38 = vpack.c.bf16 %v333_v31, %v332_v30  ;;  %v391_v27 = vld [vmem:[#allocation5 + $0x998] sm:$0xff]  ;;  %v66_v30 = vld [vmem:[#allocation2 + $0x70] sm:$0xff] }
  0x98   :  { %2462 = vmatpush3.bf16.msra.mxu0 %v2461_v44  ;;  %v2513_v44 = vpack.c.bf16 %v285_v36, %v284_v35  ;;  %v374_v35 = vld [vmem:[#allocation5 + $0x910] sm:$0xff] }
  0x99   :  { %2494 = vmatpush3.bf16.msra.mxu1 %v2493_v45  ;;  %2496 = vmatprep.subr.bf16.mxu0 %v2495_v46  ;;  %v2545_v45 = vpack.c.bf16 %v317_v39, %v316_v37  ;;  %v2515_v46 = vpack.c.bf16 %v303_v41, %v302_v40  ;;  %v375_v37 = vld [vmem:[#allocation5 + $0x918] sm:$0xff]  ;;  %v361_v39 = vld [vmem:[#allocation5 + $0x8a8] sm:$0xff]  ;;  %v392_v40 = vld [vmem:[#allocation5 + $0x9a0] sm:$0xff] }
  0x9a   :  { %2528 = vmatprep.subr.bf16.mxu1 %v2527_v50  ;;  %v2547_v50 = vpack.c.bf16 %v335_v43, %v334_v42  ;;  %v393_v41 = vld [vmem:[#allocation5 + $0x9a8] sm:$0xff] }
  0x9b   :  { %941 = vmatmul.mubr.f32.vlgmr.msra.gmra.mrb[4].mxu0 %v60_v56  ;;  %v2517_v56 = vpack.c.bf16 %v287_v48, %v286_v47  ;;  %v69_v42 = vld [vmem:[#allocation2 + $0x88] sm:$0xff]  ;;  %v344_v47 = vld [vmem:[#allocation5 + $0x820] sm:$0xff] }
  0x9c   :  { %2498 = vmatpush3.bf16.msra.mxu0 %v2497_v57  ;;  %1011 = vmatmul.mubr.f32.vlgmr.msra.gmra.mrb[4].mxu1 %v62_v58  ;;  %v2549_v57 = vpack.c.bf16 %v319_v51, %v318_v49  ;;  %v2519_v58 = vpack.c.bf16 %v305_v53, %v304_v52  ;;  %v345_v48 = vld [vmem:[#allocation5 + $0x828] sm:$0xff]  ;;  %v376_v49 = vld [vmem:[#allocation5 + $0x920] sm:$0xff]  ;;  %v362_v52 = vld [vmem:[#allocation5 + $0x8b0] sm:$0xff] }
  0x9d   :  { %2530 = vmatpush3.bf16.msra.mxu1 %v2529_v59  ;;  %2500 = vmatprep.subr.bf16.mxu0 %v2499_v60  ;;  %v288_v59 = vld [vmem:[#allocation5 + $0x660] sm:$0xff]  ;;  %v289_v60 = vld [vmem:[#allocation5 + $0x668] sm:$0xff]  ;;  %v363_v53 = vld [vmem:[#allocation5 + $0x8b8] sm:$0xff] }
  0x9e   :  { %2532 = vmatprep.subr.bf16.mxu1 %v2531_v0  ;;  %1080 = vmatprep.mubr.f32.mxu0 %v65_v6  ;;  %v306_v0 = vld [vmem:[#allocation5 + $0x6f0] sm:$0xff]  ;;  %v2521_v4 = vpack.c.bf16 %v289_v60, %v288_v59  ;;  %v377_v51 = vld [vmem:[#allocation5 + $0x928] sm:$0xff]  ;;  %v347_v60 = vld [vmem:[#allocation5 + $0x838] sm:$0xff] }
  0x9f   :  { %1150 = vmatprep.mubr.f32.mxu1 %v67_v8  ;;  %v2523_v6 = vpack.c.bf16 %v307_v1, %v306_v0  ;;  %v291_v8 = vld [vmem:[#allocation5 + $0x678] sm:$0xff]  ;;  %v346_v59 = vld [vmem:[#allocation5 + $0x830] sm:$0xff]  ;;  %v364_v0 = vld [vmem:[#allocation5 + $0x8c0] sm:$0xff] }
  0xa0   :  { %2502 = vmatpush3.bf16.msra.mxu0 %v2501_v7  ;;  %v290_v7 = vld [vmem:[#allocation5 + $0x670] sm:$0xff]  ;;  %v365_v1 = vld [vmem:[#allocation5 + $0x8c8] sm:$0xff] }
  0xa1   :  { %2534 = vmatpush3.bf16.msra.mxu1 %v2533_v9  ;;  %2504 = vmatprep.subr.bf16.mxu0 %v2503_v10  ;;  %v322_v9 = vld [vmem:[#allocation5 + $0x770] sm:$0xff]  ;;  %v2555_v10 = vpack.c.bf16 %v339_v3, %v338_v2  ;;  %v2525_v16 = vpack.c.bf16 %v291_v8, %v290_v7  ;;  %v396_v2 = vld [vmem:[#allocation5 + $0x9c0] sm:$0xff]  ;;  %v397_v3 = vld [vmem:[#allocation5 + $0x9c8] sm:$0xff] }
  0xa2   :  { %2536 = vmatprep.subr.bf16.mxu1 %v2535_v14  ;;  %v388_v14 = vld [vmem:[#allocation5 + $0x980] sm:$0xff]  ;;  %v2557_v17 = vpack.c.bf16 %v323_v11, %v322_v9  ;;  %v349_v8 = vld [vmem:[#allocation5 + $0x848] sm:$0xff] }
  0xa3   :  { %v348_v7 = vld [vmem:[#allocation5 + $0x840] sm:$0xff]  ;;  %v381_v11 = vld [vmem:[#allocation5 + $0x948] sm:$0xff] }
  0xa4   :  { %2506 = vmatpush3.bf16.msra.mxu0 %v2505_v20  ;;  %v341_v20 = vld [vmem:[#allocation5 + $0x808] sm:$0xff]  ;;  %v380_v9 = vld [vmem:[#allocation5 + $0x940] sm:$0xff] }
  0xa5   :  { %2538 = vmatpush3.bf16.msra.mxu1 %v2537_v21  ;;  %2508 = vmatprep.subr.bf16.mxu0 %v2507_v22  ;;  %v372_v21 = vld [vmem:[#allocation5 + $0x900] sm:$0xff]  ;;  %v2591_v22 = vpack.c.bf16 %v389_v15, %v388_v14  ;;  %v2561_v29 = vpack.c.bf16 %v341_v20, %v340_v19  ;;  %v398_v14 = vld [vmem:[#allocation5 + $0x9d0] sm:$0xff]  ;;  %v399_v15 = vld [vmem:[#allocation5 + $0x9d8] sm:$0xff] }
  0xa6   :  { %2540 = vmatprep.subr.bf16.mxu1 %v2539_v26  ;;  %v390_v26 = vld [vmem:[#allocation5 + $0x990] sm:$0xff]  ;;  %v2593_v31 = vpack.c.bf16 %v373_v23, %v372_v21  ;;  %v351_v20 = vld [vmem:[#allocation5 + $0x858] sm:$0xff] }
  0xa7   :  { %v2595_v36 = vpack.c.bf16 %v391_v27, %v390_v26  ;;  %v350_v19 = vld [vmem:[#allocation5 + $0x850] sm:$0xff]  ;;  %v383_v23 = vld [vmem:[#allocation5 + $0x958] sm:$0xff]  ;;  %v400_v26 = vld [vmem:[#allocation5 + $0x9e0] sm:$0xff] }
  0xa8   :  { %2510 = vmatpush3.bf16.msra.mxu0 %v2509_v32  ;;  %v2563_v32 = vpack.c.bf16 %v359_v25, %v358_v24  ;;  %v382_v21 = vld [vmem:[#allocation5 + $0x950] sm:$0xff]  ;;  %v368_v24 = vld [vmem:[#allocation5 + $0x8e0] sm:$0xff]  ;;  %v369_v25 = vld [vmem:[#allocation5 + $0x8e8] sm:$0xff] }
  0xa9   :  { %2542 = vmatpush3.bf16.msra.mxu1 %v2541_v33  ;;  %2512 = vmatprep.subr.bf16.mxu0 %v2511_v34  ;;  %v342_v33 = vld [vmem:[#allocation5 + $0x810] sm:$0xff]  ;;  %v343_v34 = vld [vmem:[#allocation5 + $0x818] sm:$0xff]  ;;  %v401_v27 = vld [vmem:[#allocation5 + $0x9e8] sm:$0xff] }
  0xaa   :  { %2544 = vmatprep.subr.bf16.mxu1 %v2543_v38  ;;  %v360_v38 = vld [vmem:[#allocation5 + $0x8a0] sm:$0xff]  ;;  %v2565_v43 = vpack.c.bf16 %v343_v34, %v342_v33  ;;  %v2615_v34 = vpack.c.bf16 %v401_v27, %v400_v26  ;;  %v458_v26 = vld [vmem:[#allocation5 + $0xbb0] sm:$0xff]  ;;  %v459_v27 = vld [vmem:[#allocation5 + $0xbb8] sm:$0xff] }
  0xab   :  { %v384_v33 = vld [vmem:[#allocation5 + $0x960] sm:$0xff] }
  0xac   :  { %2514 = vmatpush3.bf16.msra.mxu0 %v2513_v44  ;;  %v71_v44 = vld [vmem:[#allocation2 + $0x98] sm:$0xff] }
  0xad   :  { %2546 = vmatpush3.bf16.msra.mxu1 %v2545_v45  ;;  %2516 = vmatprep.subr.bf16.mxu0 %v2515_v46  ;;  %v2597_v45 = vpack.c.bf16 %v375_v37, %v374_v35  ;;  %v2567_v46 = vpack.c.bf16 %v361_v39, %v360_v38  ;;  %v385_v35 = vld [vmem:[#allocation5 + $0x968] sm:$0xff]  ;;  %v371_v37 = vld [vmem:[#allocation5 + $0x8f8] sm:$0xff]  ;;  %v402_v38 = vld [vmem:[#allocation5 + $0x9f0] sm:$0xff] }
  0xae   :  { %2548 = vmatprep.subr.bf16.mxu1 %v2547_v50  ;;  %v2599_v50 = vpack.c.bf16 %v393_v41, %v392_v40  ;;  %v403_v39 = vld [vmem:[#allocation5 + $0x9f8] sm:$0xff]  ;;  %v2617_v41 = vpack.c.bf16 %v385_v35, %v384_v33  ;;  %v442_v33 = vld [vmem:[#allocation5 + $0xb30] sm:$0xff] }
  0xaf   :  { %v443_v35 = vld [vmem:[#allocation5 + $0xb38] sm:$0xff] }
  0xb0   :  { %2518 = vmatpush3.bf16.msra.mxu0 %v2517_v56  ;;  %v2569_v56 = vpack.c.bf16 %v345_v48, %v344_v47  ;;  %v387_v47 = vld [vmem:[#allocation5 + $0x978] sm:$0xff]  ;;  %v420_v48 = vld [vmem:[#allocation5 + $0xa80] sm:$0xff] }
  0xb1   :  { %2550 = vmatpush3.bf16.msra.mxu1 %v2549_v57  ;;  %2520 = vmatprep.subr.bf16.mxu0 %v2519_v58  ;;  %v2601_v57 = vpack.c.bf16 %v377_v51, %v376_v49  ;;  %v2571_v58 = vpack.c.bf16 %v363_v53, %v362_v52  ;;  %v421_v49 = vld [vmem:[#allocation5 + $0xa88] sm:$0xff] }
  0xb2   :  { %2552 = vmatprep.subr.bf16.mxu1 %v2551_v62  ;;  %v2603_v62 = vpack.c.bf16 %v395_v55, %v394_v54  ;;  %v453_v51 = vld [vmem:[#allocation5 + $0xb88] sm:$0xff]  ;;  %v2623_v54 = vpack.c.bf16 %v421_v49, %v420_v48  ;;  %v404_v55 = vld [vmem:[#allocation5 + $0xa00] sm:$0xff]  ;;  %v430_v48 = vld [vmem:[#allocation5 + $0xad0] sm:$0xff] }
  0xb3   :  { %v431_v49 = vld [vmem:[#allocation5 + $0xad8] sm:$0xff] }
  0xb4   :  { %2522 = vmatpush3.bf16.msra.mxu0 %v2521_v4  ;;  %v2573_v4 = vpack.c.bf16 %v347_v60, %v346_v59  ;;  %v437_v59 = vld [vmem:[#allocation5 + $0xb08] sm:$0xff]  ;;  %v422_v60 = vld [vmem:[#allocation5 + $0xa90] sm:$0xff] }
  0xb5   :  { %2554 = vmatpush3.bf16.msra.mxu1 %v2553_v5  ;;  %2524 = vmatprep.subr.bf16.mxu0 %v2523_v6  ;;  %v2605_v5 = vpack.c.bf16 %v379_v63, %v378_v61  ;;  %v2575_v6 = vpack.c.bf16 %v365_v1, %v364_v0  ;;  %v423_v61 = vld [vmem:[#allocation5 + $0xa98] sm:$0xff]  ;;  %v68_v0 = vld [vmem:[#allocation2 + $0x80] sm:$0xff] }
  0xb6   :  { %2556 = vmatprep.subr.bf16.mxu1 %v2555_v10  ;;  %v2607_v10 = vpack.c.bf16 %v397_v3, %v396_v2  ;;  %v455_v63 = vld [vmem:[#allocation5 + $0xb98] sm:$0xff]  ;;  %v70_v2 = vld [vmem:[#allocation2 + $0x90] sm:$0xff] }
  0xb8   :  { %2526 = vmatpush3.bf16.msra.mxu0 %v2525_v16  ;;  %v2577_v16 = vpack.c.bf16 %v349_v8, %v348_v7  ;;  %v438_v7 = vld [vmem:[#allocation5 + $0xb10] sm:$0xff] }
  0xb9   :  { %2558 = vmatpush3.bf16.msra.mxu1 %v2557_v17  ;;  %2560 = vmatprep.subr.bf16.mxu0 %v2559_v18  ;;  %v2609_v17 = vpack.c.bf16 %v381_v11, %v380_v9  ;;  %v2579_v18 = vpack.c.bf16 %v367_v13, %v366_v12  ;;  %v439_v9 = vld [vmem:[#allocation5 + $0xb18] sm:$0xff]  ;;  %v425_v11 = vld [vmem:[#allocation5 + $0xaa8] sm:$0xff]  ;;  %v456_v12 = vld [vmem:[#allocation5 + $0xba0] sm:$0xff] }
  0xba   :  { %2592 = vmatprep.subr.bf16.mxu1 %v2591_v22  ;;  %v2611_v22 = vpack.c.bf16 %v399_v15, %v398_v14  ;;  %v457_v13 = vld [vmem:[#allocation5 + $0xba8] sm:$0xff] }
  0xbb   :  { %1081 = vmatmul.mubr.f32.vlgmr.msra.gmra.mrb[6].mxu0 %v64_v28  ;;  %v2581_v28 = vpack.c.bf16 %v351_v20, %v350_v19  ;;  %v73_v14 = vld [vmem:[#allocation2 + $0xa8] sm:$0xff]  ;;  %v408_v19 = vld [vmem:[#allocation5 + $0xa20] sm:$0xff] }
  0xbc   :  { %2562 = vmatpush3.bf16.msra.mxu0 %v2561_v29  ;;  %1151 = vmatmul.mubr.f32.vlgmr.msra.gmra.mrb[6].mxu1 %v66_v30  ;;  %v2613_v29 = vpack.c.bf16 %v383_v23, %v382_v21  ;;  %v2583_v30 = vpack.c.bf16 %v369_v25, %v368_v24  ;;  %v409_v20 = vld [vmem:[#allocation5 + $0xa28] sm:$0xff]  ;;  %v440_v21 = vld [vmem:[#allocation5 + $0xb20] sm:$0xff]  ;;  %v426_v24 = vld [vmem:[#allocation5 + $0xab0] sm:$0xff] }
  0xbd   :  { %2594 = vmatpush3.bf16.msra.mxu1 %v2593_v31  ;;  %2564 = vmatprep.subr.bf16.mxu0 %v2563_v32  ;;  %v352_v31 = vld [vmem:[#allocation5 + $0x860] sm:$0xff]  ;;  %v353_v32 = vld [vmem:[#allocation5 + $0x868] sm:$0xff]  ;;  %v427_v25 = vld [vmem:[#allocation5 + $0xab8] sm:$0xff] }
  0xbe   :  { %2596 = vmatprep.subr.bf16.mxu1 %v2595_v36  ;;  %1220 = vmatprep.mubr.f32.mxu0 %v69_v42  ;;  %v370_v36 = vld [vmem:[#allocation5 + $0x8f0] sm:$0xff]  ;;  %v2585_v40 = vpack.c.bf16 %v353_v32, %v352_v31  ;;  %v441_v23 = vld [vmem:[#allocation5 + $0xb28] sm:$0xff]  ;;  %v411_v32 = vld [vmem:[#allocation5 + $0xa38] sm:$0xff] }
  0xbf   :  { %1290 = vmatprep.mubr.f32.mxu1 %v71_v44  ;;  %v2587_v42 = vpack.c.bf16 %v371_v37, %v370_v36  ;;  %v355_v44 = vld [vmem:[#allocation5 + $0x878] sm:$0xff]  ;;  %v410_v31 = vld [vmem:[#allocation5 + $0xa30] sm:$0xff]  ;;  %v428_v36 = vld [vmem:[#allocation5 + $0xac0] sm:$0xff] }
  0xc0   :  { %2566 = vmatpush3.bf16.msra.mxu0 %v2565_v43  ;;  %v354_v43 = vld [vmem:[#allocation5 + $0x870] sm:$0xff]  ;;  %v429_v37 = vld [vmem:[#allocation5 + $0xac8] sm:$0xff] }
  0xc1   :  { %2598 = vmatpush3.bf16.msra.mxu1 %v2597_v45  ;;  %2568 = vmatprep.subr.bf16.mxu0 %v2567_v46  ;;  %v386_v45 = vld [vmem:[#allocation5 + $0x970] sm:$0xff]  ;;  %v2619_v46 = vpack.c.bf16 %v403_v39, %v402_v38  ;;  %v2589_v52 = vpack.c.bf16 %v355_v44, %v354_v43  ;;  %v460_v38 = vld [vmem:[#allocation5 + $0xbc0] sm:$0xff]  ;;  %v461_v39 = vld [vmem:[#allocation5 + $0xbc8] sm:$0xff] }
  0xc2   :  { %2600 = vmatprep.subr.bf16.mxu1 %v2599_v50  ;;  %v452_v50 = vld [vmem:[#allocation5 + $0xb80] sm:$0xff]  ;;  %v2621_v53 = vpack.c.bf16 %v387_v47, %v386_v45  ;;  %v413_v44 = vld [vmem:[#allocation5 + $0xa48] sm:$0xff] }
  0xc3   :  { %v412_v43 = vld [vmem:[#allocation5 + $0xa40] sm:$0xff]  ;;  %v445_v47 = vld [vmem:[#allocation5 + $0xb48] sm:$0xff] }
  0xc4   :  { %2570 = vmatpush3.bf16.msra.mxu0 %v2569_v56  ;;  %v405_v56 = vld [vmem:[#allocation5 + $0xa08] sm:$0xff]  ;;  %v444_v45 = vld [vmem:[#allocation5 + $0xb40] sm:$0xff] }
  0xc5   :  { %2602 = vmatpush3.bf16.msra.mxu1 %v2601_v57  ;;  %2572 = vmatprep.subr.bf16.mxu0 %v2571_v58  ;;  %v436_v57 = vld [vmem:[#allocation5 + $0xb00] sm:$0xff]  ;;  %v2655_v58 = vpack.c.bf16 %v453_v51, %v452_v50  ;;  %v2625_v1 = vpack.c.bf16 %v405_v56, %v404_v55  ;;  %v462_v50 = vld [vmem:[#allocation5 + $0xbd0] sm:$0xff]  ;;  %v463_v51 = vld [vmem:[#allocation5 + $0xbd8] sm:$0xff] }
  0xc6   :  { %2604 = vmatprep.subr.bf16.mxu1 %v2603_v62  ;;  %v454_v62 = vld [vmem:[#allocation5 + $0xb90] sm:$0xff]  ;;  %v2657_v3 = vpack.c.bf16 %v437_v59, %v436_v57  ;;  %v415_v56 = vld [vmem:[#allocation5 + $0xa58] sm:$0xff] }
  0xc7   :  { %v2659_v8 = vpack.c.bf16 %v455_v63, %v454_v62  ;;  %v414_v55 = vld [vmem:[#allocation5 + $0xa50] sm:$0xff]  ;;  %v447_v59 = vld [vmem:[#allocation5 + $0xb58] sm:$0xff]  ;;  %v464_v62 = vld [vmem:[#allocation5 + $0xbe0] sm:$0xff] }
  0xc8   :  { %2574 = vmatpush3.bf16.msra.mxu0 %v2573_v4  ;;  %v2627_v4 = vpack.c.bf16 %v423_v61, %v422_v60  ;;  %v446_v57 = vld [vmem:[#allocation5 + $0xb50] sm:$0xff]  ;;  %v432_v60 = vld [vmem:[#allocation5 + $0xae0] sm:$0xff]  ;;  %v433_v61 = vld [vmem:[#allocation5 + $0xae8] sm:$0xff] }
  0xc9   :  { %2606 = vmatpush3.bf16.msra.mxu1 %v2605_v5  ;;  %2576 = vmatprep.subr.bf16.mxu0 %v2575_v6  ;;  %v406_v5 = vld [vmem:[#allocation5 + $0xa10] sm:$0xff]  ;;  %v407_v6 = vld [vmem:[#allocation5 + $0xa18] sm:$0xff]  ;;  %v465_v63 = vld [vmem:[#allocation5 + $0xbe8] sm:$0xff] }
  0xca   :  { %2608 = vmatprep.subr.bf16.mxu1 %v2607_v10  ;;  %v424_v10 = vld [vmem:[#allocation5 + $0xaa0] sm:$0xff]  ;;  %v2629_v15 = vpack.c.bf16 %v407_v6, %v406_v5  ;;  %v2679_v6 = vpack.c.bf16 %v465_v63, %v464_v62  ;;  %v522_v62 = vld [vmem:[#allocation5 + $0xdb0] sm:$0xff]  ;;  %v523_v63 = vld [vmem:[#allocation5 + $0xdb8] sm:$0xff] }
  0xcb   :  { %v448_v5 = vld [vmem:[#allocation5 + $0xb60] sm:$0xff] }
  0xcc   :  { %2578 = vmatpush3.bf16.msra.mxu0 %v2577_v16  ;;  %v75_v16 = vld [vmem:[#allocation2 + $0xb8] sm:$0xff] }
  0xcd   :  { %2610 = vmatpush3.bf16.msra.mxu1 %v2609_v17  ;;  %2580 = vmatprep.subr.bf16.mxu0 %v2579_v18  ;;  %v2661_v17 = vpack.c.bf16 %v439_v9, %v438_v7  ;;  %v2631_v18 = vpack.c.bf16 %v425_v11, %v424_v10  ;;  %v449_v7 = vld [vmem:[#allocation5 + $0xb68] sm:$0xff]  ;;  %v435_v9 = vld [vmem:[#allocation5 + $0xaf8] sm:$0xff]  ;;  %v466_v10 = vld [vmem:[#allocation5 + $0xbf0] sm:$0xff] }
  0xce   :  { %2612 = vmatprep.subr.bf16.mxu1 %v2611_v22  ;;  %v2663_v22 = vpack.c.bf16 %v457_v13, %v456_v12  ;;  %v467_v11 = vld [vmem:[#allocation5 + $0xbf8] sm:$0xff]  ;;  %v2681_v13 = vpack.c.bf16 %v449_v7, %v448_v5  ;;  %v506_v5 = vld [vmem:[#allocation5 + $0xd30] sm:$0xff] }
  0xcf   :  { %v507_v7 = vld [vmem:[#allocation5 + $0xd38] sm:$0xff] }
  0xd0   :  { %2582 = vmatpush3.bf16.msra.mxu0 %v2581_v28  ;;  %v2633_v28 = vpack.c.bf16 %v409_v20, %v408_v19  ;;  %v451_v19 = vld [vmem:[#allocation5 + $0xb78] sm:$0xff]  ;;  %v484_v20 = vld [vmem:[#allocation5 + $0xc80] sm:$0xff] }
  0xd1   :  { %2614 = vmatpush3.bf16.msra.mxu1 %v2613_v29  ;;  %2584 = vmatprep.subr.bf16.mxu0 %v2583_v30  ;;  %v2665_v29 = vpack.c.bf16 %v441_v23, %v440_v21  ;;  %v2635_v30 = vpack.c.bf16 %v427_v25, %v426_v24  ;;  %v485_v21 = vld [vmem:[#allocation5 + $0xc88] sm:$0xff] }
  0xd2   :  { %2616 = vmatprep.subr.bf16.mxu1 %v2615_v34  ;;  %v2667_v34 = vpack.c.bf16 %v459_v27, %v458_v26  ;;  %v517_v23 = vld [vmem:[#allocation5 + $0xd88] sm:$0xff]  ;;  %v2687_v26 = vpack.c.bf16 %v485_v21, %v484_v20  ;;  %v468_v27 = vld [vmem:[#allocation5 + $0xc00] sm:$0xff]  ;;  %v494_v20 = vld [vmem:[#allocation5 + $0xcd0] sm:$0xff] }
  0xd3   :  { %v495_v21 = vld [vmem:[#allocation5 + $0xcd8] sm:$0xff] }
  0xd4   :  { %2586 = vmatpush3.bf16.msra.mxu0 %v2585_v40  ;;  %v2637_v40 = vpack.c.bf16 %v411_v32, %v410_v31  ;;  %v501_v31 = vld [vmem:[#allocation5 + $0xd08] sm:$0xff]  ;;  %v486_v32 = vld [vmem:[#allocation5 + $0xc90] sm:$0xff] }
  0xd5   :  { %2618 = vmatpush3.bf16.msra.mxu1 %v2617_v41  ;;  %2588 = vmatprep.subr.bf16.mxu0 %v2587_v42  ;;  %v2669_v41 = vpack.c.bf16 %v443_v35, %v442_v33  ;;  %v2639_v42 = vpack.c.bf16 %v429_v37, %v428_v36  ;;  %v487_v33 = vld [vmem:[#allocation5 + $0xc98] sm:$0xff]  ;;  %v72_v36 = vld [vmem:[#allocation2 + $0xa0] sm:$0xff] }
  0xd6   :  { %2620 = vmatprep.subr.bf16.mxu1 %v2619_v46  ;;  %v2671_v46 = vpack.c.bf16 %v461_v39, %v460_v38  ;;  %v519_v35 = vld [vmem:[#allocation5 + $0xd98] sm:$0xff]  ;;  %v74_v38 = vld [vmem:[#allocation2 + $0xb0] sm:$0xff] }
  0xd8   :  { %2590 = vmatpush3.bf16.msra.mxu0 %v2589_v52  ;;  %v2641_v52 = vpack.c.bf16 %v413_v44, %v412_v43  ;;  %v502_v43 = vld [vmem:[#allocation5 + $0xd10] sm:$0xff] }
  0xd9   :  { %2622 = vmatpush3.bf16.msra.mxu1 %v2621_v53  ;;  %2624 = vmatprep.subr.bf16.mxu0 %v2623_v54  ;;  %v2673_v53 = vpack.c.bf16 %v445_v47, %v444_v45  ;;  %v2643_v54 = vpack.c.bf16 %v431_v49, %v430_v48  ;;  %v503_v45 = vld [vmem:[#allocation5 + $0xd18] sm:$0xff]  ;;  %v489_v47 = vld [vmem:[#allocation5 + $0xca8] sm:$0xff]  ;;  %v520_v48 = vld [vmem:[#allocation5 + $0xda0] sm:$0xff] }
  0xda   :  { %2656 = vmatprep.subr.bf16.mxu1 %v2655_v58  ;;  %v2675_v58 = vpack.c.bf16 %v463_v51, %v462_v50  ;;  %v521_v49 = vld [vmem:[#allocation5 + $0xda8] sm:$0xff] }
  0xdb   :  { %1221 = vmatmul.mubr.f32.vlgmr.msra.gmra.mrb[8].mxu0 %v68_v0  ;;  %v2645_v0 = vpack.c.bf16 %v415_v56, %v414_v55  ;;  %v77_v50 = vld [vmem:[#allocation2 + $0xc8] sm:$0xff]  ;;  %v472_v55 = vld [vmem:[#allocation5 + $0xc20] sm:$0xff] }
  0xdc   :  { %2626 = vmatpush3.bf16.msra.mxu0 %v2625_v1  ;;  %1291 = vmatmul.mubr.f32.vlgmr.msra.gmra.mrb[8].mxu1 %v70_v2  ;;  %v2677_v1 = vpack.c.bf16 %v447_v59, %v446_v57  ;;  %v2647_v2 = vpack.c.bf16 %v433_v61, %v432_v60  ;;  %v473_v56 = vld [vmem:[#allocation5 + $0xc28] sm:$0xff]  ;;  %v504_v57 = vld [vmem:[#allocation5 + $0xd20] sm:$0xff]  ;;  %v490_v60 = vld [vmem:[#allocation5 + $0xcb0] sm:$0xff] }
  0xdd   :  { %2658 = vmatpush3.bf16.msra.mxu1 %v2657_v3  ;;  %2628 = vmatprep.subr.bf16.mxu0 %v2627_v4  ;;  %v416_v3 = vld [vmem:[#allocation5 + $0xa60] sm:$0xff]  ;;  %v417_v4 = vld [vmem:[#allocation5 + $0xa68] sm:$0xff]  ;;  %v491_v61 = vld [vmem:[#allocation5 + $0xcb8] sm:$0xff] }
  0xde   :  { %2660 = vmatprep.subr.bf16.mxu1 %v2659_v8  ;;  %1360 = vmatprep.mubr.f32.mxu0 %v73_v14  ;;  %v434_v8 = vld [vmem:[#allocation5 + $0xaf0] sm:$0xff]  ;;  %v2649_v12 = vpack.c.bf16 %v417_v4, %v416_v3  ;;  %v505_v59 = vld [vmem:[#allocation5 + $0xd28] sm:$0xff]  ;;  %v475_v4 = vld [vmem:[#allocation5 + $0xc38] sm:$0xff] }
  0xdf   :  { %1430 = vmatprep.mubr.f32.mxu1 %v75_v16  ;;  %v2651_v14 = vpack.c.bf16 %v435_v9, %v434_v8  ;;  %v419_v16 = vld [vmem:[#allocation5 + $0xa78] sm:$0xff]  ;;  %v474_v3 = vld [vmem:[#allocation5 + $0xc30] sm:$0xff]  ;;  %v492_v8 = vld [vmem:[#allocation5 + $0xcc0] sm:$0xff] }
  0xe0   :  { %2630 = vmatpush3.bf16.msra.mxu0 %v2629_v15  ;;  %v418_v15 = vld [vmem:[#allocation5 + $0xa70] sm:$0xff]  ;;  %v493_v9 = vld [vmem:[#allocation5 + $0xcc8] sm:$0xff] }
  0xe1   :  { %2662 = vmatpush3.bf16.msra.mxu1 %v2661_v17  ;;  %2632 = vmatprep.subr.bf16.mxu0 %v2631_v18  ;;  %v450_v17 = vld [vmem:[#allocation5 + $0xb70] sm:$0xff]  ;;  %v2683_v18 = vpack.c.bf16 %v467_v11, %v466_v10  ;;  %v2653_v24 = vpack.c.bf16 %v419_v16, %v418_v15  ;;  %v524_v10 = vld [vmem:[#allocation5 + $0xdc0] sm:$0xff]  ;;  %v525_v11 = vld [vmem:[#allocation5 + $0xdc8] sm:$0xff] }
  0xe2   :  { %2664 = vmatprep.subr.bf16.mxu1 %v2663_v22  ;;  %v516_v22 = vld [vmem:[#allocation5 + $0xd80] sm:$0xff]  ;;  %v2685_v25 = vpack.c.bf16 %v451_v19, %v450_v17  ;;  %v477_v16 = vld [vmem:[#allocation5 + $0xc48] sm:$0xff] }
  0xe3   :  { %v476_v15 = vld [vmem:[#allocation5 + $0xc40] sm:$0xff]  ;;  %v509_v19 = vld [vmem:[#allocation5 + $0xd48] sm:$0xff] }
  0xe4   :  { %2634 = vmatpush3.bf16.msra.mxu0 %v2633_v28  ;;  %v469_v28 = vld [vmem:[#allocation5 + $0xc08] sm:$0xff]  ;;  %v508_v17 = vld [vmem:[#allocation5 + $0xd40] sm:$0xff] }
  0xe5   :  { %2666 = vmatpush3.bf16.msra.mxu1 %v2665_v29  ;;  %2636 = vmatprep.subr.bf16.mxu0 %v2635_v30  ;;  %v500_v29 = vld [vmem:[#allocation5 + $0xd00] sm:$0xff]  ;;  %v2719_v30 = vpack.c.bf16 %v517_v23, %v516_v22  ;;  %v2689_v37 = vpack.c.bf16 %v469_v28, %v468_v27  ;;  %v526_v22 = vld [vmem:[#allocation5 + $0xdd0] sm:$0xff]  ;;  %v527_v23 = vld [vmem:[#allocation5 + $0xdd8] sm:$0xff] }
  0xe6   :  { %2668 = vmatprep.subr.bf16.mxu1 %v2667_v34  ;;  %v518_v34 = vld [vmem:[#allocation5 + $0xd90] sm:$0xff]  ;;  %v2721_v39 = vpack.c.bf16 %v501_v31, %v500_v29  ;;  %v479_v28 = vld [vmem:[#allocation5 + $0xc58] sm:$0xff] }
  0xe7   :  { %v2723_v44 = vpack.c.bf16 %v519_v35, %v518_v34  ;;  %v478_v27 = vld [vmem:[#allocation5 + $0xc50] sm:$0xff]  ;;  %v511_v31 = vld [vmem:[#allocation5 + $0xd58] sm:$0xff]  ;;  %v528_v34 = vld [vmem:[#allocation5 + $0xde0] sm:$0xff] }
  0xe8   :  { %2638 = vmatpush3.bf16.msra.mxu0 %v2637_v40  ;;  %v2691_v40 = vpack.c.bf16 %v487_v33, %v486_v32  ;;  %v510_v29 = vld [vmem:[#allocation5 + $0xd50] sm:$0xff]  ;;  %v496_v32 = vld [vmem:[#allocation5 + $0xce0] sm:$0xff]  ;;  %v497_v33 = vld [vmem:[#allocation5 + $0xce8] sm:$0xff] }
  0xe9   :  { %2670 = vmatpush3.bf16.msra.mxu1 %v2669_v41  ;;  %2640 = vmatprep.subr.bf16.mxu0 %v2639_v42  ;;  %v470_v41 = vld [vmem:[#allocation5 + $0xc10] sm:$0xff]  ;;  %v471_v42 = vld [vmem:[#allocation5 + $0xc18] sm:$0xff]  ;;  %v529_v35 = vld [vmem:[#allocation5 + $0xde8] sm:$0xff] }
  0xea   :  { %2672 = vmatprep.subr.bf16.mxu1 %v2671_v46  ;;  %v488_v46 = vld [vmem:[#allocation5 + $0xca0] sm:$0xff]  ;;  %v2693_v51 = vpack.c.bf16 %v471_v42, %v470_v41  ;;  %v2743_v42 = vpack.c.bf16 %v529_v35, %v528_v34  ;;  %v586_v34 = vld [vmem:[#allocation5 + $0xfb0] sm:$0xff]  ;;  %v587_v35 = vld [vmem:[#allocation5 + $0xfb8] sm:$0xff] }
  0xeb   :  { %v512_v41 = vld [vmem:[#allocation5 + $0xd60] sm:$0xff] }
  0xec   :  { %2642 = vmatpush3.bf16.msra.mxu0 %v2641_v52  ;;  %v79_v52 = vld [vmem:[#allocation2 + $0xd8] sm:$0xff] }
  0xed   :  { %2674 = vmatpush3.bf16.msra.mxu1 %v2673_v53  ;;  %2644 = vmatprep.subr.bf16.mxu0 %v2643_v54  ;;  %v2725_v53 = vpack.c.bf16 %v503_v45, %v502_v43  ;;  %v2695_v54 = vpack.c.bf16 %v489_v47, %v488_v46  ;;  %v513_v43 = vld [vmem:[#allocation5 + $0xd68] sm:$0xff]  ;;  %v499_v45 = vld [vmem:[#allocation5 + $0xcf8] sm:$0xff]  ;;  %v530_v46 = vld [vmem:[#allocation5 + $0xdf0] sm:$0xff] }
  0xee   :  { %2676 = vmatprep.subr.bf16.mxu1 %v2675_v58  ;;  %v2727_v58 = vpack.c.bf16 %v521_v49, %v520_v48  ;;  %v531_v47 = vld [vmem:[#allocation5 + $0xdf8] sm:$0xff]  ;;  %v2745_v49 = vpack.c.bf16 %v513_v43, %v512_v41  ;;  %v570_v41 = vld [vmem:[#allocation5 + $0xf30] sm:$0xff] }
  0xef   :  { %v571_v43 = vld [vmem:[#allocation5 + $0xf38] sm:$0xff] }
  0xf0   :  { %2646 = vmatpush3.bf16.msra.mxu0 %v2645_v0  ;;  %v2697_v0 = vpack.c.bf16 %v473_v56, %v472_v55  ;;  %v515_v55 = vld [vmem:[#allocation5 + $0xd78] sm:$0xff]  ;;  %v548_v56 = vld [vmem:[#allocation5 + $0xe80] sm:$0xff] }
  0xf1   :  { %2678 = vmatpush3.bf16.msra.mxu1 %v2677_v1  ;;  %2648 = vmatprep.subr.bf16.mxu0 %v2647_v2  ;;  %v2729_v1 = vpack.c.bf16 %v505_v59, %v504_v57  ;;  %v2699_v2 = vpack.c.bf16 %v491_v61, %v490_v60  ;;  %v549_v57 = vld [vmem:[#allocation5 + $0xe88] sm:$0xff] }
  0xf2   :  { %2680 = vmatprep.subr.bf16.mxu1 %v2679_v6  ;;  %v2731_v6 = vpack.c.bf16 %v523_v63, %v522_v62  ;;  %v581_v59 = vld [vmem:[#allocation5 + $0xf88] sm:$0xff]  ;;  %v2751_v62 = vpack.c.bf16 %v549_v57, %v548_v56  ;;  %v532_v63 = vld [vmem:[#allocation5 + $0xe00] sm:$0xff]  ;;  %v558_v56 = vld [vmem:[#allocation5 + $0xed0] sm:$0xff] }
  0xf3   :  { %v559_v57 = vld [vmem:[#allocation5 + $0xed8] sm:$0xff] }
  0xf4   :  { %2650 = vmatpush3.bf16.msra.mxu0 %v2649_v12  ;;  %v2701_v12 = vpack.c.bf16 %v475_v4, %v474_v3  ;;  %v565_v3 = vld [vmem:[#allocation5 + $0xf08] sm:$0xff]  ;;  %v550_v4 = vld [vmem:[#allocation5 + $0xe90] sm:$0xff] }
  0xf5   :  { %2682 = vmatpush3.bf16.msra.mxu1 %v2681_v13  ;;  %2652 = vmatprep.subr.bf16.mxu0 %v2651_v14  ;;  %v2733_v13 = vpack.c.bf16 %v507_v7, %v506_v5  ;;  %v2703_v14 = vpack.c.bf16 %v493_v9, %v492_v8  ;;  %v551_v5 = vld [vmem:[#allocation5 + $0xe98] sm:$0xff]  ;;  %v76_v8 = vld [vmem:[#allocation2 + $0xc0] sm:$0xff] }
  0xf6   :  { %2684 = vmatprep.subr.bf16.mxu1 %v2683_v18  ;;  %v2735_v18 = vpack.c.bf16 %v525_v11, %v524_v10  ;;  %v583_v7 = vld [vmem:[#allocation5 + $0xf98] sm:$0xff]  ;;  %v78_v10 = vld [vmem:[#allocation2 + $0xd0] sm:$0xff] }
  0xf8   :  { %2654 = vmatpush3.bf16.msra.mxu0 %v2653_v24  ;;  %v2705_v24 = vpack.c.bf16 %v477_v16, %v476_v15  ;;  %v566_v15 = vld [vmem:[#allocation5 + $0xf10] sm:$0xff] }
  0xf9   :  { %2686 = vmatpush3.bf16.msra.mxu1 %v2685_v25  ;;  %2688 = vmatprep.subr.bf16.mxu0 %v2687_v26  ;;  %v2737_v25 = vpack.c.bf16 %v509_v19, %v508_v17  ;;  %v2707_v26 = vpack.c.bf16 %v495_v21, %v494_v20  ;;  %v567_v17 = vld [vmem:[#allocation5 + $0xf18] sm:$0xff]  ;;  %v553_v19 = vld [vmem:[#allocation5 + $0xea8] sm:$0xff]  ;;  %v584_v20 = vld [vmem:[#allocation5 + $0xfa0] sm:$0xff] }
  0xfa   :  { %2720 = vmatprep.subr.bf16.mxu1 %v2719_v30  ;;  %v2739_v30 = vpack.c.bf16 %v527_v23, %v526_v22  ;;  %v585_v21 = vld [vmem:[#allocation5 + $0xfa8] sm:$0xff] }
  0xfb   :  { %1361 = vmatmul.mubr.f32.vlgmr.msra.gmra.mrb[10].mxu0 %v72_v36  ;;  %v2709_v36 = vpack.c.bf16 %v479_v28, %v478_v27  ;;  %v81_v22 = vld [vmem:[#allocation2 + $0xe8] sm:$0xff]  ;;  %v536_v27 = vld [vmem:[#allocation5 + $0xe20] sm:$0xff] }
  0xfc   :  { %2690 = vmatpush3.bf16.msra.mxu0 %v2689_v37  ;;  %1431 = vmatmul.mubr.f32.vlgmr.msra.gmra.mrb[10].mxu1 %v74_v38  ;;  %v2741_v37 = vpack.c.bf16 %v511_v31, %v510_v29  ;;  %v2711_v38 = vpack.c.bf16 %v497_v33, %v496_v32  ;;  %v537_v28 = vld [vmem:[#allocation5 + $0xe28] sm:$0xff]  ;;  %v568_v29 = vld [vmem:[#allocation5 + $0xf20] sm:$0xff]  ;;  %v554_v32 = vld [vmem:[#allocation5 + $0xeb0] sm:$0xff] }
  0xfd   :  { %2722 = vmatpush3.bf16.msra.mxu1 %v2721_v39  ;;  %2692 = vmatprep.subr.bf16.mxu0 %v2691_v40  ;;  %v480_v39 = vld [vmem:[#allocation5 + $0xc60] sm:$0xff]  ;;  %v481_v40 = vld [vmem:[#allocation5 + $0xc68] sm:$0xff]  ;;  %v555_v33 = vld [vmem:[#allocation5 + $0xeb8] sm:$0xff] }
  0xfe   :  { %2724 = vmatprep.subr.bf16.mxu1 %v2723_v44  ;;  %1500 = vmatprep.mubr.f32.mxu0 %v77_v50  ;;  %v498_v44 = vld [vmem:[#allocation5 + $0xcf0] sm:$0xff]  ;;  %v2713_v48 = vpack.c.bf16 %v481_v40, %v480_v39  ;;  %v569_v31 = vld [vmem:[#allocation5 + $0xf28] sm:$0xff]  ;;  %v539_v40 = vld [vmem:[#allocation5 + $0xe38] sm:$0xff] }
  0xff   :  { %1570 = vmatprep.mubr.f32.mxu1 %v79_v52  ;;  %v2715_v50 = vpack.c.bf16 %v499_v45, %v498_v44  ;;  %v483_v52 = vld [vmem:[#allocation5 + $0xc78] sm:$0xff]  ;;  %v538_v39 = vld [vmem:[#allocation5 + $0xe30] sm:$0xff]  ;;  %v556_v44 = vld [vmem:[#allocation5 + $0xec0] sm:$0xff] }
 0x100   :  { %2694 = vmatpush3.bf16.msra.mxu0 %v2693_v51  ;;  %v482_v51 = vld [vmem:[#allocation5 + $0xc70] sm:$0xff]  ;;  %v557_v45 = vld [vmem:[#allocation5 + $0xec8] sm:$0xff] }
 0x101   :  { %2726 = vmatpush3.bf16.msra.mxu1 %v2725_v53  ;;  %2696 = vmatprep.subr.bf16.mxu0 %v2695_v54  ;;  %v514_v53 = vld [vmem:[#allocation5 + $0xd70] sm:$0xff]  ;;  %v2747_v54 = vpack.c.bf16 %v531_v47, %v530_v46  ;;  %v2717_v60 = vpack.c.bf16 %v483_v52, %v482_v51  ;;  %v588_v46 = vld [vmem:[#allocation5 + $0xfc0] sm:$0xff]  ;;  %v589_v47 = vld [vmem:[#allocation5 + $0xfc8] sm:$0xff] }
 0x102   :  { %2728 = vmatprep.subr.bf16.mxu1 %v2727_v58  ;;  %v580_v58 = vld [vmem:[#allocation5 + $0xf80] sm:$0xff]  ;;  %v2749_v61 = vpack.c.bf16 %v515_v55, %v514_v53  ;;  %v541_v52 = vld [vmem:[#allocation5 + $0xe48] sm:$0xff] }
 0x103   :  { %v540_v51 = vld [vmem:[#allocation5 + $0xe40] sm:$0xff]  ;;  %v573_v55 = vld [vmem:[#allocation5 + $0xf48] sm:$0xff] }
 0x104   :  { %2698 = vmatpush3.bf16.msra.mxu0 %v2697_v0  ;;  %v533_v0 = vld [vmem:[#allocation5 + $0xe08] sm:$0xff]  ;;  %v572_v53 = vld [vmem:[#allocation5 + $0xf40] sm:$0xff] }
 0x105   :  { %2730 = vmatpush3.bf16.msra.mxu1 %v2729_v1  ;;  %2700 = vmatprep.subr.bf16.mxu0 %v2699_v2  ;;  %v564_v1 = vld [vmem:[#allocation5 + $0xf00] sm:$0xff]  ;;  %v2783_v2 = vpack.c.bf16 %v581_v59, %v580_v58  ;;  %v2753_v9 = vpack.c.bf16 %v533_v0, %v532_v63  ;;  %v590_v58 = vld [vmem:[#allocation5 + $0xfd0] sm:$0xff]  ;;  %v591_v59 = vld [vmem:[#allocation5 + $0xfd8] sm:$0xff] }
 0x106   :  { %2732 = vmatprep.subr.bf16.mxu1 %v2731_v6  ;;  %v582_v6 = vld [vmem:[#allocation5 + $0xf90] sm:$0xff]  ;;  %v2785_v11 = vpack.c.bf16 %v565_v3, %v564_v1  ;;  %v543_v0 = vld [vmem:[#allocation5 + $0xe58] sm:$0xff] }
 0x107   :  { %v2787_v16 = vpack.c.bf16 %v583_v7, %v582_v6  ;;  %v542_v63 = vld [vmem:[#allocation5 + $0xe50] sm:$0xff]  ;;  %v575_v3 = vld [vmem:[#allocation5 + $0xf58] sm:$0xff]  ;;  %v592_v6 = vld [vmem:[#allocation5 + $0xfe0] sm:$0xff] }
 0x108   :  { %2702 = vmatpush3.bf16.msra.mxu0 %v2701_v12  ;;  %v2755_v12 = vpack.c.bf16 %v551_v5, %v550_v4  ;;  %v574_v1 = vld [vmem:[#allocation5 + $0xf50] sm:$0xff]  ;;  %v560_v4 = vld [vmem:[#allocation5 + $0xee0] sm:$0xff]  ;;  %v561_v5 = vld [vmem:[#allocation5 + $0xee8] sm:$0xff] }
 0x109   :  { %2734 = vmatpush3.bf16.msra.mxu1 %v2733_v13  ;;  %2704 = vmatprep.subr.bf16.mxu0 %v2703_v14  ;;  %v534_v13 = vld [vmem:[#allocation5 + $0xe10] sm:$0xff]  ;;  %v535_v14 = vld [vmem:[#allocation5 + $0xe18] sm:$0xff]  ;;  %v593_v7 = vld [vmem:[#allocation5 + $0xfe8] sm:$0xff] }
 0x10a   :  { %2736 = vmatprep.subr.bf16.mxu1 %v2735_v18  ;;  %v552_v18 = vld [vmem:[#allocation5 + $0xea0] sm:$0xff]  ;;  %v2757_v23 = vpack.c.bf16 %v535_v14, %v534_v13 }
 0x10b   :  { %v576_v13 = vld [vmem:[#allocation5 + $0xf60] sm:$0xff] }
 0x10c   :  { %2706 = vmatpush3.bf16.msra.mxu0 %v2705_v24  ;;  %v83_v24 = vld [vmem:[#allocation2 + $0xf8] sm:$0xff] }
 0x10d   :  { %2738 = vmatpush3.bf16.msra.mxu1 %v2737_v25  ;;  %2708 = vmatprep.subr.bf16.mxu0 %v2707_v26  ;;  %v2789_v25 = vpack.c.bf16 %v567_v17, %v566_v15  ;;  %v2759_v26 = vpack.c.bf16 %v553_v19, %v552_v18  ;;  %v2807_v15 = vpack.c.bf16 %v593_v7, %v592_v6  ;;  %v562_v17 = vld [vmem:[#allocation5 + $0xef0] sm:$0xff]  ;;  %v563_v18 = vld [vmem:[#allocation5 + $0xef8] sm:$0xff] }
 0x10e   :  { %2740 = vmatprep.subr.bf16.mxu1 %v2739_v30  ;;  %v2791_v30 = vpack.c.bf16 %v585_v21, %v584_v20  ;;  %v594_v21 = vld [vmem:[#allocation5 + $0xff0] sm:$0xff] }
 0x110   :  { %2710 = vmatpush3.bf16.msra.mxu0 %v2709_v36  ;;  %v2761_v36 = vpack.c.bf16 %v537_v28, %v536_v27  ;;  %v2779_v28 = vpack.c.bf16 %v563_v18, %v562_v17 }
 0x111   :  { %2742 = vmatpush3.bf16.msra.mxu1 %v2741_v37  ;;  %2712 = vmatprep.subr.bf16.mxu0 %v2711_v38  ;;  %v2793_v37 = vpack.c.bf16 %v569_v31, %v568_v29  ;;  %v2763_v38 = vpack.c.bf16 %v555_v33, %v554_v32  ;;  %v546_v29 = vld [vmem:[#allocation5 + $0xe70] sm:$0xff]  ;;  %v579_v33 = vld [vmem:[#allocation5 + $0xf78] sm:$0xff] }
 0x112   :  { %2744 = vmatprep.subr.bf16.mxu1 %v2743_v42  ;;  %v2795_v42 = vpack.c.bf16 %v587_v35, %v586_v34  ;;  %v578_v32 = vld [vmem:[#allocation5 + $0xf70] sm:$0xff] }
 0x114   :  { %2714 = vmatpush3.bf16.msra.mxu0 %v2713_v48  ;;  %v2765_v48 = vpack.c.bf16 %v539_v40, %v538_v39 }
 0x115   :  { %2746 = vmatpush3.bf16.msra.mxu1 %v2745_v49  ;;  %2716 = vmatprep.subr.bf16.mxu0 %v2715_v50  ;;  %v2797_v49 = vpack.c.bf16 %v571_v43, %v570_v41  ;;  %v2767_v50 = vpack.c.bf16 %v557_v45, %v556_v44 }
 0x116   :  { %2748 = vmatprep.subr.bf16.mxu1 %v2747_v54  ;;  %v2799_v54 = vpack.c.bf16 %v589_v47, %v588_v46 }
 0x118   :  { %2718 = vmatpush3.bf16.msra.mxu0 %v2717_v60  ;;  %v2769_v60 = vpack.c.bf16 %v541_v52, %v540_v51 }
 0x119   :  { %2750 = vmatpush3.bf16.msra.mxu1 %v2749_v61  ;;  %2752 = vmatprep.subr.bf16.mxu0 %v2751_v62  ;;  %v2801_v61 = vpack.c.bf16 %v573_v55, %v572_v53  ;;  %v2771_v62 = vpack.c.bf16 %v559_v57, %v558_v56 }
 0x11a   :  { %2784 = vmatprep.subr.bf16.mxu1 %v2783_v2  ;;  %v2803_v2 = vpack.c.bf16 %v591_v59, %v590_v58 }
 0x11b   :  { %1501 = vmatmul.mubr.f32.vlgmr.msra.gmra.mrb[12].mxu0 %v76_v8  ;;  %v2773_v8 = vpack.c.bf16 %v543_v0, %v542_v63 }
 0x11c   :  { %2754 = vmatpush3.bf16.msra.mxu0 %v2753_v9  ;;  %1571 = vmatmul.mubr.f32.vlgmr.msra.gmra.mrb[12].mxu1 %v78_v10  ;;  %v2805_v9 = vpack.c.bf16 %v575_v3, %v574_v1  ;;  %v2775_v10 = vpack.c.bf16 %v561_v5, %v560_v4 }
 0x11d   :  { %2786 = vmatpush3.bf16.msra.mxu1 %v2785_v11  ;;  %2756 = vmatprep.subr.bf16.mxu0 %v2755_v12  ;;  %v544_v11 = vld [vmem:[#allocation5 + $0xe60] sm:$0xff]  ;;  %v545_v12 = vld [vmem:[#allocation5 + $0xe68] sm:$0xff] }
 0x11e   :  { %2788 = vmatprep.subr.bf16.mxu1 %v2787_v16  ;;  %1640 = vmatprep.mubr.f32.mxu0 %v81_v22  ;;  %v577_v16 = vld [vmem:[#allocation5 + $0xf68] sm:$0xff]  ;;  %v595_v22 = vld [vmem:[#allocation5 + $0xff8] sm:$0xff] }
 0x11f   :  { %1710 = vmatprep.mubr.f32.mxu1 %v83_v24  ;;  %v2809_v27 = vpack.c.bf16 %v577_v16, %v576_v13  ;;  %v2811_v31 = vpack.c.bf16 %v595_v22, %v594_v21 }
 0x120   :  { %2758 = vmatpush3.bf16.msra.mxu0 %v2757_v23 }
 0x121   :  { %2790 = vmatpush3.bf16.msra.mxu1 %v2789_v25  ;;  %2760 = vmatprep.subr.bf16.mxu0 %v2759_v26  ;;  %v2777_v25 = vpack.c.bf16 %v545_v12, %v544_v11 }
 0x122   :  { %2792 = vmatprep.subr.bf16.mxu1 %v2791_v30  ;;  %v547_v30 = vld [vmem:[#allocation5 + $0xe78] sm:$0xff] }
 0x123   :  { %v2781_v35 = vpack.c.bf16 %v547_v30, %v546_v29  ;;  %v1742_v30 = vld [vmem:[#allocation7] ss:$0 sm:$0xff] }
 0x124   :  { %2762 = vmatpush3.bf16.msra.mxu0 %v2761_v36  ;;  %v2813_v36 = vpack.c.bf16 %v579_v33, %v578_v32 }
 0x125   :  { %2794 = vmatpush3.bf16.msra.mxu1 %v2793_v37  ;;  %2764 = vmatprep.subr.bf16.mxu0 %v2763_v38  ;;  %v80_v37 = vld [vmem:[#allocation2 + $0xe0] sm:$0xff]  ;;  %v82_v38 = vld [vmem:[#allocation2 + $0xf0] sm:$0xff] }
 0x126   :  { %2796 = vmatprep.subr.bf16.mxu1 %v2795_v42 }
 0x128   :  { %2766 = vmatpush3.bf16.msra.mxu0 %v2765_v48 }
 0x129   :  { %2798 = vmatpush3.bf16.msra.mxu1 %v2797_v49  ;;  %2768 = vmatprep.subr.bf16.mxu0 %v2767_v50 }
 0x12a   :  { %2800 = vmatprep.subr.bf16.mxu1 %v2799_v54 }
 0x12c   :  { %2770 = vmatpush3.bf16.msra.mxu0 %v2769_v60 }
 0x12d   :  { %2802 = vmatpush3.bf16.msra.mxu1 %v2801_v61  ;;  %2772 = vmatprep.subr.bf16.mxu0 %v2771_v62 }
 0x12e   :  { %v1775_v14 = vpop.f32.mrb[0].mxu0  ;;  %2804 = vmatprep.subr.bf16.mxu1 %v2803_v2 }
 0x12f   :  { %v1810_v19 = vpop.f32.mrb[0].mxu1  ;;  %v1776_v20 = vpop.f32.mrb[1].mxu0 }
 0x130   :  { %v1777_v23 = vadd.f32 %v1776_v20, %v1775_v14  ;;  %v1811_v24 = vpop.f32.mrb[1].mxu1  ;;  %2774 = vmatpush3.bf16.msra.mxu0 %v2773_v8 }
 0x131   :  { %v1812_v26 = vadd.f32 %v1811_v24, %v1810_v19  ;;  %2806 = vmatpush3.bf16.msra.mxu1 %v2805_v9  ;;  %2776 = vmatprep.subr.bf16.mxu0 %v2775_v10 }
 0x132   :  { %2808 = vmatprep.subr.bf16.mxu1 %v2807_v15 }
 0x133   :  { %v733_v34 = vadd.f32 %v1812_v26, %v1777_v23 }
 0x134   :  { %2778 = vmatpush3.bf16.msra.mxu0 %v2777_v25 }
 0x135   :  { %2810 = vmatpush3.bf16.msra.mxu1 %v2809_v27  ;;  %2780 = vmatprep.subr.bf16.mxu0 %v2779_v28 }
 0x136   :  { %2812 = vmatprep.subr.bf16.mxu1 %v2811_v31 }
 0x138   :  { %2782 = vmatpush3.bf16.msra.mxu0 %v2781_v35 }
 0x139   :  { %2814 = vmatpush3.bf16.msra.mxu1 %v2813_v36 }
 0x13b   :  { %1641 = vmatmul.mubr.f32.vlgmr.msra.gmra.mrb[14].mxu0 %v80_v37 }
 0x13c   :  { %1711 = vmatmul.mubr.f32.vlgmr.msra.gmra.mrb[14].mxu1 %v82_v38 }
 0x14e   :  { %v1845_v39 = vpop.f32.mrb[2].mxu0 }
 0x14f   :  { %v1846_v40 = vpop.f32.mrb[3].mxu0  ;;  %v1880_v41 = vpop.f32.mrb[2].mxu1 }
 0x150   :  { %v1847_v42 = vadd.f32 %v1846_v40, %v1845_v39  ;;  %v1881_v43 = vpop.f32.mrb[3].mxu1 }
 0x151   :  { %v1882_v44 = vadd.f32 %v1881_v43, %v1880_v41 }
 0x152   :  { %v803_v45 = vadd.f32 %v1847_v42, %v733_v34 }
 0x154   :  { %v873_v46 = vadd.f32 %v1882_v44, %v803_v45 }
 0x16e   :  { %v1915_v47 = vpop.f32.mrb[4].mxu0 }
 0x16f   :  { %v1916_v48 = vpop.f32.mrb[5].mxu0  ;;  %v1950_v49 = vpop.f32.mrb[4].mxu1 }
 0x170   :  { %v1917_v50 = vadd.f32 %v1916_v48, %v1915_v47  ;;  %v1951_v51 = vpop.f32.mrb[5].mxu1 }
 0x171   :  { %v1952_v52 = vadd.f32 %v1951_v51, %v1950_v49 }
 0x172   :  { %v943_v53 = vadd.f32 %v1917_v50, %v873_v46 }
 0x174   :  { %v1013_v54 = vadd.f32 %v1952_v52, %v943_v53 }
 0x18e   :  { %v1985_v55 = vpop.f32.mrb[6].mxu0 }
 0x18f   :  { %v1986_v56 = vpop.f32.mrb[7].mxu0  ;;  %v2020_v57 = vpop.f32.mrb[6].mxu1 }
 0x190   :  { %v1987_v58 = vadd.f32 %v1986_v56, %v1985_v55  ;;  %v2021_v59 = vpop.f32.mrb[7].mxu1 }
 0x191   :  { %v2022_v60 = vadd.f32 %v2021_v59, %v2020_v57 }
 0x192   :  { %v1083_v61 = vadd.f32 %v1987_v58, %v1013_v54 }
 0x194   :  { %v1153_v62 = vadd.f32 %v2022_v60, %v1083_v61 }
 0x1ae   :  { %v2055_v63 = vpop.f32.mrb[8].mxu0 }
 0x1af   :  { %v2056_v0 = vpop.f32.mrb[9].mxu0  ;;  %v2090_v1 = vpop.f32.mrb[8].mxu1 }
 0x1b0   :  { %v2057_v2 = vadd.f32 %v2056_v0, %v2055_v63  ;;  %v2091_v3 = vpop.f32.mrb[9].mxu1 }
 0x1b1   :  { %v2092_v4 = vadd.f32 %v2091_v3, %v2090_v1 }
 0x1b2   :  { %v1223_v5 = vadd.f32 %v2057_v2, %v1153_v62 }
 0x1b4   :  { %v1293_v6 = vadd.f32 %v2092_v4, %v1223_v5 }
 0x1ce   :  { %v2125_v7 = vpop.f32.mrb[10].mxu0 }
 0x1cf   :  { %v2126_v8 = vpop.f32.mrb[11].mxu0  ;;  %v2160_v9 = vpop.f32.mrb[10].mxu1 }
 0x1d0   :  { %v2127_v10 = vadd.f32 %v2126_v8, %v2125_v7  ;;  %v2161_v11 = vpop.f32.mrb[11].mxu1 }
 0x1d1   :  { %v2162_v12 = vadd.f32 %v2161_v11, %v2160_v9 }
 0x1d2   :  { %v1363_v13 = vadd.f32 %v2127_v10, %v1293_v6 }
 0x1d4   :  { %v1433_v14 = vadd.f32 %v2162_v12, %v1363_v13 }
 0x1ee   :  { %v2195_v15 = vpop.f32.mrb[12].mxu0 }
 0x1ef   :  { %v2196_v16 = vpop.f32.mrb[13].mxu0  ;;  %v2230_v17 = vpop.f32.mrb[12].mxu1 }
 0x1f0   :  { %v2197_v18 = vadd.f32 %v2196_v16, %v2195_v15  ;;  %v2231_v19 = vpop.f32.mrb[13].mxu1 }
 0x1f1   :  { %v2232_v20 = vadd.f32 %v2231_v19, %v2230_v17 }
 0x1f2   :  { %v1503_v21 = vadd.f32 %v2197_v18, %v1433_v14 }
 0x1f4   :  { %v1573_v22 = vadd.f32 %v2232_v20, %v1503_v21 }
 0x20e   :  { %v2265_v23 = vpop.f32.mrb[14].mxu0 }
 0x20f   :  { %v2266_v24 = vpop.f32.mrb[15].mxu0  ;;  %v2300_v25 = vpop.f32.mrb[14].mxu1 }
 0x210   :  { %v2267_v26 = vadd.f32 %v2266_v24, %v2265_v23  ;;  %v2301_v27 = vpop.f32.mrb[15].mxu1 }
 0x211   :  { %v2302_v28 = vadd.f32 %v2301_v27, %v2300_v25 }
 0x212   :  { %v1643_v29 = vadd.f32 %v2267_v26, %v1573_v22 }
 0x214   :  { %v1713_v31 = vadd.f32 %v2302_v28, %v1643_v29 }
 0x216   :  { %v1723_v32 = vadd.f32 %v1742_v30, %v1713_v31 }
 0x218   :  { %1725 = vst.msk [vmem:[#allocation8] sm:$0xff] %vm1724_vm0, %v1723_v32 }
 0x219   :  { %2898 = shalt.err (!%p2895_p0)
}
 0x21a   :  { %s2899_s26 = scalar_lea.hbm %s2992_s3, 128 }
 0x21b   :  { %p2900_p1 = scmp.ne.s32.totalorder %s2992_s3, %s2899_s26  ;;  %p2903_p2 = scmp.lt.u32.totalorder %s2899_s26, %s2992_s3 }
 0x21d   :  { %p2905_p3 = pnand %p2903_p2, %p2900_p1 }
 0x21f   :  { %2908 = shalt.err (!%p2905_p3)
}
 0x220   :  { %1735 = dma.vmem_to_hbm [thread:$0]  %s1733_s22, 128, %s2992_s3, [#allocation4]  }
 0x221   :  { %2913 = dma.done.wait [#allocation4], 128  }
 0x222   :  { %2914 = vsyncadd [#allocation4], 4294967168 }
 0x223   :  { %1739 = vsyncpa [#allocation3], 1 }
 0x224   :  { %1740 = vsyncpa [#allocation6], 1 }
 0x225   :  { %1741 = vsyncpa [#allocation4], 1 }

</bundles_post_ra>
